<compile_context>
chip_gen: v5e
topology: v5e:2x2
jax: 0.10.0
libtpu: 0.0.40
codegen_flags: <defaults>
</compile_context>

<pallas_src>
import functools

import jax
import jax.numpy as jnp
from jax import lax
from jax.experimental import pallas as pl
from jax.experimental.pallas import tpu as pltpu

LN_EPS = 1e-5
B_BLK = 8              # batch rows per block == one full f32 sublane tile


def _layernorm(v, g, b):
    mu = jnp.mean(v, axis=-1, keepdims=True)
    var = jnp.mean(jnp.square(v - mu), axis=-1, keepdims=True)
    return (v - mu) * lax.rsqrt(var + LN_EPS) * g + b


@functools.lru_cache(maxsize=None)
def _roll_direction():
    """One-time probe of pltpu.roll's rotation convention.

    Returns +1 if pltpu.roll matches jnp.roll (result[i] = x[i - shift]),
    -1 if it is the opposite rotation, 0 if roll is unavailable (fallback to a
    copy-based shift).  Keeps the time-shift on the XLU slot without risking a
    silently wrong shift direction across library versions.
    """
    try:
        def k(x_ref, o_ref):
            o_ref[...] = pltpu.roll(x_ref[...], shift=1, axis=0)

        probe = pl.pallas_call(
            k, out_shape=jax.ShapeDtypeStruct((8, 128), jnp.int32)
        )(lax.broadcasted_iota(jnp.int32, (8, 128), 0))
        val = int(probe[1, 0])
        if val == 0:
            return 1
        if val == 2:
            return -1
        return 0
    except Exception:   # pragma: no cover - roll unsupported -> concat fallback
        return 0


def _time_shift(v, prev, t_chunk, b_blk, roll_shift):
    """shifted[t, b, :] = v[t-1, b, :] within the chunk; row t == 0 comes from prev.

    v is (t_chunk*b_blk, C), time-major within the block (row = t*b_blk + b);
    prev is (b_blk, C) = last time-step rows of the previous chunk (zeros for
    the first chunk).
    """
    m, c = v.shape
    if t_chunk == 1:
        return prev
    if roll_shift is None:
        # Fallback copy-shift (vst/vld) -- only if pltpu.roll is unavailable.
        return jnp.concatenate([prev, v[:m - b_blk, :]], axis=0)
    rolled = pltpu.roll(v, shift=roll_shift, axis=0)      # rolled[i] = v[i - b_blk]
    r3 = rolled.reshape(t_chunk, b_blk, c)
    t_idx = lax.broadcasted_iota(jnp.int32, (t_chunk, 1, 1), 0)
    return jnp.where(t_idx == 0, prev[None, :, :], r3).reshape(m, c)


def rwkv_block_kernel(x_ref,
                      ln1_g, ln1_b, ln2_g, ln2_b,
                      atm_k, atm_v, atm_r,
                      time_decay, time_first,
                      wk, wv, wr, wo,
                      ftm_k, ftm_r,
                      w_key, w_rec, w_val,
                      out_ref,
                      k_scr, v_scr, num_scr, den_scr,
                      num_st, den_st, max_st,
                      prev_y, prev_z,
                      x1_scr, zk_scr, gate_scr, kv_acc,
                      *, t_chunk, b_blk, n_f, approx_recip, roll_shift):
    t = pl.program_id(1)
    f = pl.program_id(2)
    A = wk.shape[1]
    cdt = wk.dtype                      # MXU input dtype (bf16 fast / f32 exact)
    mc = t_chunk * b_blk

    # ---- attention branch + FFN prologue: once per (batch-block, T-chunk) ----
    @pl.when(f == 0)
    def _attention_and_ffn_prologue():
        @pl.when(t == 0)
        def _reset_carried_state():
            num_st[...] = jnp.zeros_like(num_st)
            den_st[...] = jnp.zeros_like(den_st)
            max_st[...] = jnp.full_like(max_st, -1e38)
            prev_y[...] = jnp.zeros_like(prev_y)
            prev_z[...] = jnp.zeros_like(prev_z)

        x = x_ref[0]                                        # (mc, C) f32
        # ln1 + time-mix:  xx + mix*(x - xx) shares one subtraction across mixes.
        y = _layernorm(x, ln1_g[...], ln1_b[...])
        yy = _time_shift(y, prev_y[...], t_chunk, b_blk, roll_shift)
        prev_y[...] = y[mc - b_blk:, :]                     # carry last time step
        d = y - yy
        xk = yy + atm_k[...] * d
        xv = yy + atm_v[...] * d
        xr = yy + atm_r[...] * d

        # Projections: one MXU call each with M = mc rows; k/v staged in VMEM so
        # every recurrence step reads an aligned (b_blk, A) slab.
        k_scr[...] = jnp.dot(xk.astype(cdt), wk[...],
                             preferred_element_type=jnp.float32)
        v_scr[...] = jnp.dot(xv.astype(cdt), wv[...],
                             preferred_element_type=jnp.float32)
        r = jnp.dot(xr.astype(cdt), wr[...], preferred_element_type=jnp.float32)
        sr = jax.nn.sigmoid(r)

        # ---- WKV recurrence (rwkv_linear_attention_cpu, f32 throughout) ----
        w_dec = jnp.broadcast_to(-jnp.exp(time_decay[...]), (b_blk, A))
        u = jnp.broadcast_to(time_first[...], (b_blk, A))

        def one_step(i, carry):
            num, den, mx = carry
            idx = pl.multiple_of(i * b_blk, b_blk)
            kt = k_scr[pl.ds(idx, b_blk), :]
            vt = v_scr[pl.ds(idx, b_blk), :]
            ku = kt + u
            m_out = jnp.maximum(mx, ku)
            e1 = jnp.exp(mx - m_out)
            e2 = jnp.exp(ku - m_out)
            num_scr[pl.ds(idx, b_blk), :] = e1 * num + e2 * vt
            den_scr[pl.ds(idx, b_blk), :] = e1 * den + e2
            mw = mx + w_dec
            m_st = jnp.maximum(mw, kt)
            e1s = jnp.exp(mw - m_st)
            e2s = jnp.exp(kt - m_st)
            return e1s * num + e2s * vt, e1s * den + e2s, m_st

        # Moderate trace-time unroll (4-8) of a rolled loop: amortizes per-step
        # loop overhead without blowing vreg pressure at large A.
        unroll = next(uu for uu in (8, 4, 2, 1) if t_chunk % uu == 0)

        def unrolled_body(i, carry):
            for j in range(unroll):
                carry = one_step(i * unroll + j, carry)
            return carry

        carry0 = (num_st[...], den_st[...], max_st[...])
        num_f, den_f, max_f = lax.fori_loop(
            0, t_chunk // unroll, unrolled_body, carry0)
        num_st[...] = num_f                                 # carry across T-chunks
        den_st[...] = den_f
        max_st[...] = max_f

        # One wide reciprocal (EUP slot on the approx path) instead of t_chunk
        # serial divides.
        rwkv = num_scr[...] * pl.reciprocal(den_scr[...], approx=approx_recip)
        att = jnp.dot((sr * rwkv).astype(cdt), wo[...],
                      preferred_element_type=jnp.float32)
        x1 = x + att
        x1_scr[...] = x1

        # ---- FFN prologue: ln2, time-mix, receptance gate, zero accumulator ----
        z = _layernorm(x1, ln2_g[...], ln2_b[...])
        zz = _time_shift(z, prev_z[...], t_chunk, b_blk, roll_shift)
        prev_z[...] = z[mc - b_blk:, :]
        dz = z - zz
        zk_scr[...] = (zz + ftm_k[...] * dz).astype(cdt)
        zr = zz + ftm_r[...] * dz
        gate_scr[...] = jax.nn.sigmoid(
            jnp.dot(zr.astype(cdt), w_rec[...],
                    preferred_element_type=jnp.float32))
        kv_acc[...] = jnp.zeros_like(kv_acc)

    # ---- FFN main: streamed over F-chunks (runs for every f) ----
    kf = jnp.dot(zk_scr[...], w_key[...], preferred_element_type=jnp.float32)
    kf = jnp.square(jnp.maximum(kf, 0.0))
    kv_acc[...] += jnp.dot(kf.astype(cdt), w_val[...],
                           preferred_element_type=jnp.float32)

    @pl.when(f == n_f - 1)
    def _finalize():
        out_ref[0] = x1_scr[...] + gate_scr[...] * kv_acc[...]

    # TODO(synk): layer_id == 0 prologue (ln0 + pos_emb) and incremental `state`
    # caching (use_cache=True) are not exercised here (layer_id != 0, state=None).


def _pick_chunk(total, target, multiple):
    """Largest divisor of `total` that is <= target and a multiple of `multiple`;
    falls back to `total` (single chunk)."""
    best = None
    for c in range(multiple, total + 1, multiple):
        if c > target:
            break
        if total % c == 0:
            best = c
    return best if best is not None else total


def rwkv_block(x, p, *, matmul_dtype=jnp.bfloat16, t_chunk=None, f_chunk=None):
    """One RwkvBlock forward (layer_id != 0, no state / cache) as a Pallas kernel.

    `p` holds the block parameters with nn.Linear weights pre-transposed to
    (in, out) layout and 1-D per-channel parameters stored as (1, dim).
    """
    B, T, C = x.shape
    A = p["wk"].shape[1]
    F = p["w_key"].shape[1]
    b_blk = B_BLK

    # Pad the batch to a multiple of 8 so every recurrence slab is a full
    # (8, A) sublane tile and every pl.ds start stays 8-aligned.
    b_pad = -(-B // b_blk) * b_blk
    if b_pad != B:
        x = jnp.concatenate([x, jnp.zeros((b_pad - B, T, C), x.dtype)], axis=0)
    n_blk = b_pad // b_blk

    if t_chunk is None:
        t_chunk = _pick_chunk(T, 32, 1)      # Mc = 8*t_chunk rows (256 at prod dims)
    assert T % t_chunk == 0
    n_tc = T // t_chunk
    mc = t_chunk * b_blk

    if f_chunk is None:
        f_chunk = _pick_chunk(F, 1024, 128)  # streamed FFN weight chunk
    assert F % f_chunk == 0
    n_fc = F // f_chunk

    # Time-major-within-block layout (XLA-side reshape/transpose):
    # x_blk[j, t*b_blk + b, :] == x[j*b_blk + b, t, :]
    x_blk = (x.astype(jnp.float32)
              .reshape(n_blk, b_blk, T, C)
              .transpose(0, 2, 1, 3)
              .reshape(n_blk, T * b_blk, C))

    # MXU operands in bf16 by default (halves weight DMA bytes + residency);
    # all element-wise / recurrence math stays f32 inside the kernel.
    wdt = jnp.dtype(matmul_dtype)
    wk, wv, wr, wo = (p[k].astype(wdt) for k in ("wk", "wv", "wr", "wo"))
    w_key, w_rec, w_val = (p[k].astype(wdt) for k in ("w_key", "w_rec", "w_val"))
    approx_recip = wdt != jnp.dtype(jnp.float32)

    direction = _roll_direction()
    if direction == 1:
        roll_shift = b_blk
    elif direction == -1:
        roll_shift = (mc - b_blk) % mc
    else:
        roll_shift = None                    # concat fallback inside the kernel

    # TODO(synk): once pl.Buffered(1) single-buffering of constant-index weight
    # blocks is stable in the deployed jax, apply it to every const() spec below
    # (weights never change block index, so double-buffering only doubles VMEM).
    def const(shape):
        n = len(shape)
        return pl.BlockSpec(shape, lambda b, t, f, _n=n: (0,) * _n)

    in_specs = [
        pl.BlockSpec((1, mc, C), lambda b, t, f: (b, t, 0)),          # x (time-major)
        const((1, C)), const((1, C)), const((1, C)), const((1, C)),  # ln1/ln2 g, b
        const((1, C)), const((1, C)), const((1, C)),                  # att time-mix k/v/r
        const((1, A)), const((1, A)),                                 # time_decay, time_first
        const((C, A)), const((C, A)), const((C, A)), const((A, C)),  # Wk Wv Wr Wo
        const((1, C)), const((1, C)),                                 # ffn time-mix k/r
        pl.BlockSpec((C, f_chunk), lambda b, t, f: (0, f)),           # W_key (streamed)
        const((C, C)),                                                # W_receptance
        pl.BlockSpec((f_chunk, C), lambda b, t, f: (f, 0)),           # W_value (streamed)
    ]

    scratch_shapes = [
        pltpu.VMEM((mc, A), jnp.float32),      # k rows
        pltpu.VMEM((mc, A), jnp.float32),      # v rows
        pltpu.VMEM((mc, A), jnp.float32),      # wkv numerators
        pltpu.VMEM((mc, A), jnp.float32),      # wkv denominators
        pltpu.VMEM((b_blk, A), jnp.float32),   # carried num state
        pltpu.VMEM((b_blk, A), jnp.float32),   # carried den state
        pltpu.VMEM((b_blk, A), jnp.float32),   # carried max state
        pltpu.VMEM((b_blk, C), jnp.float32),   # carried last ln1 rows (attn shift)
        pltpu.VMEM((b_blk, C), jnp.float32),   # carried last ln2 rows (ffn shift)
        pltpu.VMEM((mc, C), jnp.float32),      # x + attention
        pltpu.VMEM((mc, C), wdt),              # ffn key input (MXU dtype)
        pltpu.VMEM((mc, C), jnp.float32),      # sigmoid(receptance) gate
        pltpu.VMEM((mc, C), jnp.float32),      # ffn value accumulator
    ]

    kernel = functools.partial(
        rwkv_block_kernel, t_chunk=t_chunk, b_blk=b_blk, n_f=n_fc,
        approx_recip=bool(approx_recip), roll_shift=roll_shift)

    # TODO(synk): output last dim is lane-dense only when C is a multiple of 128
    # (true for real n_embd); the toy C=32 config tolerates masked stores.
    # TODO(synk): on v7x, add an A-split parallel axis (needs an accumulator for
    # the Wo projection, which contracts A) or ensure n_blk >= 2 so both
    # TensorCores are busy.
    out_blk = pl.pallas_call(
        kernel,
        out_shape=jax.ShapeDtypeStruct((n_blk, T * b_blk, C), jnp.float32),
        grid_spec=pltpu.PrefetchScalarGridSpec(
            num_scalar_prefetch=0,
            grid=(n_blk, n_tc, n_fc),
            in_specs=in_specs,
            out_specs=pl.BlockSpec((1, mc, C), lambda b, t, f: (b, t, 0)),
            scratch_shapes=scratch_shapes),
        compiler_params=pltpu.CompilerParams(
            dimension_semantics=("parallel", "arbitrary", "arbitrary"),
            vmem_limit_bytes=64 * 1024 * 1024),
    )(x_blk,
      p["ln1_g"], p["ln1_b"], p["ln2_g"], p["ln2_b"],
      p["atm_k"], p["atm_v"], p["atm_r"],
      p["time_decay"], p["time_first"],
      wk, wv, wr, wo,
      p["ftm_k"], p["ftm_r"],
      w_key, w_rec, w_val)

    out = (out_blk.reshape(n_blk, T, b_blk, C)
                  .transpose(0, 2, 1, 3)
                  .reshape(b_pad, T, C))
    return out[:B]


# ---------------------------------------------------------------------------
# Plain-JAX f32 reference (mirrors the PyTorch forward) for correctness checks.
# ---------------------------------------------------------------------------
def rwkv_block_ref(x, p):
    hp = lax.Precision.HIGHEST

    def ln(v, g, b):
        mu = jnp.mean(v, axis=-1, keepdims=True)
        var = jnp.mean(jnp.square(v - mu), axis=-1, keepdims=True)
        return (v - mu) * lax.rsqrt(var + LN_EPS) * g[0] + b[0]

    def tshift(v):
        return jnp.concatenate([jnp.zeros_like(v[:, :1]), v[:, :-1]], axis=1)

    B, T, C = x.shape
    A = p["wk"].shape[1]

    y = ln(x, p["ln1_g"], p["ln1_b"])
    yy = tshift(y)
    xk = y * p["atm_k"][0] + yy * (1 - p["atm_k"][0])
    xv = y * p["atm_v"][0] + yy * (1 - p["atm_v"][0])
    xr = y * p["atm_r"][0] + yy * (1 - p["atm_r"][0])
    k = jnp.dot(xk, p["wk"], precision=hp)
    v = jnp.dot(xv, p["wv"], precision=hp)
    r = jnp.dot(xr, p["wr"], precision=hp)
    sr = jax.nn.sigmoid(r)

    w = -jnp.exp(p["time_decay"][0])
    u = p["time_first"][0]
    num = jnp.zeros((B, A)); den = jnp.zeros((B, A)); mx = jnp.full((B, A), -1e38)
    outs = []
    for t in range(T):
        kt, vt = k[:, t], v[:, t]
        mo = jnp.maximum(mx, kt + u)
        e1, e2 = jnp.exp(mx - mo), jnp.exp(kt + u - mo)
        outs.append((e1 * num + e2 * vt) / (e1 * den + e2))
        ms = jnp.maximum(mx + w, kt)
        e1, e2 = jnp.exp(mx + w - ms), jnp.exp(kt - ms)
        num, den, mx = e1 * num + e2 * vt, e1 * den + e2, ms
    rwkv = jnp.stack(outs, axis=1)

    x1 = x + jnp.dot(sr * rwkv, p["wo"], precision=hp)
    z = ln(x1, p["ln2_g"], p["ln2_b"])
    zz = tshift(z)
    zk = z * p["ftm_k"][0] + zz * (1 - p["ftm_k"][0])
    zr = z * p["ftm_r"][0] + zz * (1 - p["ftm_r"][0])
    kf = jnp.square(jnp.maximum(jnp.dot(zk, p["w_key"], precision=hp), 0.0))
    return x1 + jax.nn.sigmoid(jnp.dot(zr, p["w_rec"], precision=hp)) * jnp.dot(
        kf, p["w_val"], precision=hp)


# ---------------------------------------------------------------------------
if __name__ == "__main__":
    B, T, C = 2, 8, 32          # batch, ctx_len, n_embd
    A, F = 32, 256              # dim_att (= n_embd), dim_ffn

    key = jax.random.PRNGKey(0)
    ks = jax.random.split(key, 16)
    rnd = lambda k, s, scale=0.1: (scale * jax.random.normal(k, s)).astype(jnp.float32)

    params = {
        "ln1_g": jnp.ones((1, C), jnp.float32),
        "ln1_b": jnp.zeros((1, C), jnp.float32),
        "ln2_g": jnp.ones((1, C), jnp.float32),
        "ln2_b": jnp.zeros((1, C), jnp.float32),
        "atm_k": jax.random.uniform(ks[0], (1, C)).astype(jnp.float32),
        "atm_v": jax.random.uniform(ks[1], (1, C)).astype(jnp.float32),
        "atm_r": jax.random.uniform(ks[2], (1, C)).astype(jnp.float32),
        "time_decay": rnd(ks[3], (1, A), 0.5),
        "time_first": rnd(ks[4], (1, A), 0.5),
        "wk": rnd(ks[5], (C, A)),
        "wv": rnd(ks[6], (C, A)),
        "wr": rnd(ks[7], (C, A)),
        "wo": rnd(ks[8], (A, C)),
        "ftm_k": jax.random.uniform(ks[9], (1, C)).astype(jnp.float32),
        "ftm_r": jax.random.uniform(ks[10], (1, C)).astype(jnp.float32),
        "w_key": rnd(ks[11], (C, F)),
        "w_rec": rnd(ks[12], (C, C)),
        "w_val": rnd(ks[13], (F, C)),
    }

    x = rnd(ks[14], (B, T, C), 1.0)

    ref = jax.block_until_ready(rwkv_block_ref(x, params))

    # Exact-math path (f32 MXU operands) with small explicit chunks so the
    # T-chunk state carry (T=8 -> 2 chunks) and the streamed-FFN accumulator
    # (F=256 -> 2 chunks) are both exercised.
    out_f32 = jax.block_until_ready(
        rwkv_block(x, params, matmul_dtype=jnp.float32, t_chunk=4, f_chunk=128))
    assert out_f32.shape == (B, T, C) and out_f32.dtype == jnp.float32
    assert jnp.allclose(out_f32, ref, atol=2e-2, rtol=2e-2), \
        f"f32 path: max abs diff {jnp.max(jnp.abs(out_f32 - ref))}"

    # Default fast path (bf16 MXU operands, f32 accumulation / f32 recurrence,
    # approx EUP reciprocal, auto chunk selection).
    out_bf16 = jax.block_until_ready(rwkv_block(x, params))
    assert out_bf16.shape == (B, T, C) and out_bf16.dtype == jnp.float32
    assert jnp.allclose(out_bf16, ref, atol=5e-2, rtol=5e-2), \
        f"bf16 path: max abs diff {jnp.max(jnp.abs(out_bf16 - ref))}"

    print("KERNEL_OK")
</pallas_src>

<mosaic_0001>
module attributes {stable_mosaic.version = 11 : i64} {
  func.func @k(%arg0: memref<8x128xi32, #tpu.memory_space<vmem>>, %arg1: memref<8x128xi32, #tpu.memory_space<vmem>>) attributes {dimension_semantics = [], scalar_prefetch = 0 : i64, scratch_operands = 0 : i64, tpu.core_type = #tpu.core_type<tc>} {
    %c0 = arith.constant 0 : index
    %c0_0 = arith.constant 0 : index
    %0 = vector.load %arg0[%c0, %c0_0] : memref<8x128xi32, #tpu.memory_space<vmem>>, vector<8x128xi32>
    %c1_i32 = arith.constant 1 : i32
    %1 = tpu.dynamic_rotate %0 by %c1_i32 dim 0 : vector<8x128xi32>, i32 -> vector<8x128xi32>
    %c0_1 = arith.constant 0 : index
    %c0_2 = arith.constant 0 : index
    %2 = vector.load %arg1[%c0_1, %c0_2] : memref<8x128xi32, #tpu.memory_space<vmem>>, vector<8x128xi32>
    tpu.vector_store %arg1[%c0_1, %c0_2], %1 {strides = array<i32>} : memref<8x128xi32, #tpu.memory_space<vmem>>, vector<8x128xi32>,
    return
  }
}

module attributes {stable_mosaic.version = 11 : i64} {
  func.func @rwkv_block_kernel(%arg0: i32, %arg1: i32, %arg2: i32, %arg3: memref<1x32x32xf32, #tpu.memory_space<vmem>>, %arg4: memref<1x32xf32, #tpu.memory_space<vmem>>, %arg5: memref<1x32xf32, #tpu.memory_space<vmem>>, %arg6: memref<1x32xf32, #tpu.memory_space<vmem>>, %arg7: memref<1x32xf32, #tpu.memory_space<vmem>>, %arg8: memref<1x32xf32, #tpu.memory_space<vmem>>, %arg9: memref<1x32xf32, #tpu.memory_space<vmem>>, %arg10: memref<1x32xf32, #tpu.memory_space<vmem>>, %arg11: memref<1x32xf32, #tpu.memory_space<vmem>>, %arg12: memref<1x32xf32, #tpu.memory_space<vmem>>, %arg13: memref<32x32xf32, #tpu.memory_space<vmem>>, %arg14: memref<32x32xf32, #tpu.memory_space<vmem>>, %arg15: memref<32x32xf32, #tpu.memory_space<vmem>>, %arg16: memref<32x32xf32, #tpu.memory_space<vmem>>, %arg17: memref<1x32xf32, #tpu.memory_space<vmem>>, %arg18: memref<1x32xf32, #tpu.memory_space<vmem>>, %arg19: memref<32x128xf32, #tpu.memory_space<vmem>>, %arg20: memref<32x32xf32, #tpu.memory_space<vmem>>, %arg21: memref<128x32xf32, #tpu.memory_space<vmem>>, %arg22: memref<1x32x32xf32, #tpu.memory_space<vmem>>, %arg23: memref<32x32xf32, #tpu.memory_space<vmem>>, %arg24: memref<32x32xf32, #tpu.memory_space<vmem>>, %arg25: memref<32x32xf32, #tpu.memory_space<vmem>>, %arg26: memref<32x32xf32, #tpu.memory_space<vmem>>, %arg27: memref<8x32xf32, #tpu.memory_space<vmem>>, %arg28: memref<8x32xf32, #tpu.memory_space<vmem>>, %arg29: memref<8x32xf32, #tpu.memory_space<vmem>>, %arg30: memref<8x32xf32, #tpu.memory_space<vmem>>, %arg31: memref<8x32xf32, #tpu.memory_space<vmem>>, %arg32: memref<32x32xf32, #tpu.memory_space<vmem>>, %arg33: memref<32x32xf32, #tpu.memory_space<vmem>>, %arg34: memref<32x32xf32, #tpu.memory_space<vmem>>, %arg35: memref<32x32xf32, #tpu.memory_space<vmem>>) attributes {dimension_semantics = [#tpu.dimension_semantics<parallel>, #tpu.dimension_semantics<arbitrary>, #tpu.dimension_semantics<arbitrary>], iteration_bounds = array<i64: 1, 2, 2>, scalar_prefetch = 0 : i64, scratch_operands = 13 : i64, tpu.core_type = #tpu.core_type<tc>, window_params = [{transform_indices = @transform_0, window_bounds = array<i64: 1, 32, 32>}, {pipeline_mode = #tpu.pipeline_mode<synchronous>, transform_indices = @transform_1, window_bounds = array<i64: 1, 32>}, {pipeline_mode = #tpu.pipeline_mode<synchronous>, transform_indices = @transform_2, window_bounds = array<i64: 1, 32>}, {pipeline_mode = #tpu.pipeline_mode<synchronous>, transform_indices = @transform_3, window_bounds = array<i64: 1, 32>}, {pipeline_mode = #tpu.pipeline_mode<synchronous>, transform_indices = @transform_4, window_bounds = array<i64: 1, 32>}, {pipeline_mode = #tpu.pipeline_mode<synchronous>, transform_indices = @transform_5, window_bounds = array<i64: 1, 32>}, {pipeline_mode = #tpu.pipeline_mode<synchronous>, transform_indices = @transform_6, window_bounds = array<i64: 1, 32>}, {pipeline_mode = #tpu.pipeline_mode<synchronous>, transform_indices = @transform_7, window_bounds = array<i64: 1, 32>}, {pipeline_mode = #tpu.pipeline_mode<synchronous>, transform_indices = @transform_8, window_bounds = array<i64: 1, 32>}, {pipeline_mode = #tpu.pipeline_mode<synchronous>, transform_indices = @transform_9, window_bounds = array<i64: 1, 32>}, {pipeline_mode = #tpu.pipeline_mode<synchronous>, transform_indices = @transform_10, window_bounds = array<i64: 32, 32>}, {pipeline_mode = #tpu.pipeline_mode<synchronous>, transform_indices = @transform_11, window_bounds = array<i64: 32, 32>}, {pipeline_mode = #tpu.pipeline_mode<synchronous>, transform_indices = @transform_12, window_bounds = array<i64: 32, 32>}, {pipeline_mode = #tpu.pipeline_mode<synchronous>, transform_indices = @transform_13, window_bounds = array<i64: 32, 32>}, {pipeline_mode = #tpu.pipeline_mode<synchronous>, transform_indices = @transform_14, window_bounds = array<i64: 1, 32>}, {pipeline_mode = #tpu.pipeline_mode<synchronous>, transform_indices = @transform_15, window_bounds = array<i64: 1, 32>}, {transform_indices = @transform_16, window_bounds = array<i64: 32, 128>}, {pipeline_mode = #tpu.pipeline_mode<synchronous>, transform_indices = @transform_17, window_bounds = array<i64: 32, 32>}, {transform_indices = @transform_18, window_bounds = array<i64: 128, 32>}, {transform_indices = @transform_19, window_bounds = array<i64: 1, 32, 32>}]} {
    %c0_i32 = arith.constant 0 : i32
    %0 = arith.cmpi eq, %arg2, %c0_i32 : i32
    %1 = arith.extui %0 : i1 to i32
    %c0_i32_0 = arith.constant 0 : i32
    %2 = arith.cmpi ne, %1, %c0_i32_0 : i32
    scf.if %2 {
      %c0_i32_13 = arith.constant 0 : i32
      %17 = arith.cmpi eq, %arg1, %c0_i32_13 : i32
      %18 = arith.extui %17 : i1 to i32
      %c0_i32_14 = arith.constant 0 : i32
      %19 = arith.cmpi ne, %18, %c0_i32_14 : i32
      scf.if %19 {
        %cst_131 = arith.constant 0.000000e+00 : f32
        %286 = vector.broadcast %cst_131 : f32 to vector<8x32xf32>
        %c0_132 = arith.constant 0 : index
        %c0_133 = arith.constant 0 : index
        %287 = vector.load %arg27[%c0_132, %c0_133] : memref<8x32xf32, #tpu.memory_space<vmem>>, vector<8x32xf32>
        tpu.vector_store %arg27[%c0_132, %c0_133], %286 {strides = array<i32>} : memref<8x32xf32, #tpu.memory_space<vmem>>, vector<8x32xf32>,
        %cst_134 = arith.constant 0.000000e+00 : f32
        %288 = vector.broadcast %cst_134 : f32 to vector<8x32xf32>
        %c0_135 = arith.constant 0 : index
        %c0_136 = arith.constant 0 : index
        %289 = vector.load %arg28[%c0_135, %c0_136] : memref<8x32xf32, #tpu.memory_space<vmem>>, vector<8x32xf32>
        tpu.vector_store %arg28[%c0_135, %c0_136], %288 {strides = array<i32>} : memref<8x32xf32, #tpu.memory_space<vmem>>, vector<8x32xf32>,
        %cst_137 = arith.constant -9.99999968E+37 : f32
        %290 = vector.broadcast %cst_137 : f32 to vector<8x32xf32>
        %c0_138 = arith.constant 0 : index
        %c0_139 = arith.constant 0 : index
        %291 = vector.load %arg29[%c0_138, %c0_139] : memref<8x32xf32, #tpu.memory_space<vmem>>, vector<8x32xf32>
        tpu.vector_store %arg29[%c0_138, %c0_139], %290 {strides = array<i32>} : memref<8x32xf32, #tpu.memory_space<vmem>>, vector<8x32xf32>,
        %cst_140 = arith.constant 0.000000e+00 : f32
        %292 = vector.broadcast %cst_140 : f32 to vector<8x32xf32>
        %c0_141 = arith.constant 0 : index
        %c0_142 = arith.constant 0 : index
        %293 = vector.load %arg30[%c0_141, %c0_142] : memref<8x32xf32, #tpu.memory_space<vmem>>, vector<8x32xf32>
        tpu.vector_store %arg30[%c0_141, %c0_142], %292 {strides = array<i32>} : memref<8x32xf32, #tpu.memory_space<vmem>>, vector<8x32xf32>,
        %cst_143 = arith.constant 0.000000e+00 : f32
        %294 = vector.broadcast %cst_143 : f32 to vector<8x32xf32>
        %c0_144 = arith.constant 0 : index
        %c0_145 = arith.constant 0 : index
        %295 = vector.load %arg31[%c0_144, %c0_145] : memref<8x32xf32, #tpu.memory_space<vmem>>, vector<8x32xf32>
        tpu.vector_store %arg31[%c0_144, %c0_145], %294 {strides = array<i32>} : memref<8x32xf32, #tpu.memory_space<vmem>>, vector<8x32xf32>,
      } else {
      }
      %c0_15 = arith.constant 0 : index
      %c0_16 = arith.constant 0 : index
      %c0_17 = arith.constant 0 : index
      %20 = vector.load %arg3[%c0_15, %c0_16, %c0_17] : memref<1x32x32xf32, #tpu.memory_space<vmem>>, vector<1x32x32xf32>
      %21 = vector.shape_cast %20 : vector<1x32x32xf32> to vector<32x32xf32>
      %c0_18 = arith.constant 0 : index
      %c0_19 = arith.constant 0 : index
      %22 = vector.load %arg4[%c0_18, %c0_19] : memref<1x32xf32, #tpu.memory_space<vmem>>, vector<1x32xf32>
      %c0_20 = arith.constant 0 : index
      %c0_21 = arith.constant 0 : index
      %23 = vector.load %arg5[%c0_20, %c0_21] : memref<1x32xf32, #tpu.memory_space<vmem>>, vector<1x32xf32>
      %cst_22 = arith.constant dense<0.000000e+00> : vector<32xf32>
      %24 = vector.multi_reduction <add>, %21, %cst_22 [1] : vector<32x32xf32> to vector<32xf32>
      %25 = vector.shape_cast %24 : vector<32xf32> to vector<32x1xf32>
      %cst_23 = arith.constant 3.200000e+01 : f32
      %26 = vector.broadcast %cst_23 : f32 to vector<32x1xf32>
      %27 = arith.divf %25, %26 : vector<32x1xf32>
      %28 = vector.broadcast %27 : vector<32x1xf32> to vector<32x32xf32>
      %29 = arith.subf %21, %28 : vector<32x32xf32>
      %30 = arith.mulf %29, %29 : vector<32x32xf32>
      %cst_24 = arith.constant dense<0.000000e+00> : vector<32xf32>
      %31 = vector.multi_reduction <add>, %30, %cst_24 [1] : vector<32x32xf32> to vector<32xf32>
      %32 = vector.shape_cast %31 : vector<32xf32> to vector<32x1xf32>
      %cst_25 = arith.constant 3.200000e+01 : f32
      %33 = vector.broadcast %cst_25 : f32 to vector<32x1xf32>
      %34 = arith.divf %32, %33 : vector<32x1xf32>
      %35 = vector.broadcast %27 : vector<32x1xf32> to vector<32x32xf32>
      %36 = arith.subf %21, %35 : vector<32x32xf32>
      %cst_26 = arith.constant 9.99999974E-6 : f32
      %37 = vector.broadcast %cst_26 : f32 to vector<32x1xf32>
      %38 = arith.addf %34, %37 : vector<32x1xf32>
      %39 = math.rsqrt %38 : vector<32x1xf32>
      %40 = vector.broadcast %39 : vector<32x1xf32> to vector<32x32xf32>
      %41 = arith.mulf %36, %40 : vector<32x32xf32>
      %42 = vector.broadcast %22 : vector<1x32xf32> to vector<32x32xf32>
      %43 = arith.mulf %41, %42 : vector<32x32xf32>
      %44 = vector.broadcast %23 : vector<1x32xf32> to vector<32x32xf32>
      %45 = arith.addf %43, %44 : vector<32x32xf32>
      %c0_27 = arith.constant 0 : index
      %c0_28 = arith.constant 0 : index
      %46 = vector.load %arg30[%c0_27, %c0_28] : memref<8x32xf32, #tpu.memory_space<vmem>>, vector<8x32xf32>
      %47 = vector.extract_strided_slice %45 {offsets = [0, 0], sizes = [24, 32], strides = [1, 1]} : vector<32x32xf32> to vector<24x32xf32>
      %48 = tpu.concatenate %46, %47 in 0 : vector<8x32xf32>, vector<24x32xf32> -> vector<32x32xf32>
      %49 = vector.extract_strided_slice %45 {offsets = [24, 0], sizes = [8, 32], strides = [1, 1]} : vector<32x32xf32> to vector<8x32xf32>
      %c0_29 = arith.constant 0 : index
      %c0_30 = arith.constant 0 : index
      %50 = vector.load %arg30[%c0_29, %c0_30] : memref<8x32xf32, #tpu.memory_space<vmem>>, vector<8x32xf32>
      tpu.vector_store %arg30[%c0_29, %c0_30], %49 {strides = array<i32>} : memref<8x32xf32, #tpu.memory_space<vmem>>, vector<8x32xf32>,
      %51 = arith.subf %45, %48 : vector<32x32xf32>
      %c0_31 = arith.constant 0 : index
      %c0_32 = arith.constant 0 : index
      %52 = vector.load %arg8[%c0_31, %c0_32] : memref<1x32xf32, #tpu.memory_space<vmem>>, vector<1x32xf32>
      %53 = vector.broadcast %52 : vector<1x32xf32> to vector<32x32xf32>
      %54 = arith.mulf %53, %51 : vector<32x32xf32>
      %55 = arith.addf %48, %54 : vector<32x32xf32>
      %c0_33 = arith.constant 0 : index
      %c0_34 = arith.constant 0 : index
      %56 = vector.load %arg9[%c0_33, %c0_34] : memref<1x32xf32, #tpu.memory_space<vmem>>, vector<1x32xf32>
      %57 = vector.broadcast %56 : vector<1x32xf32> to vector<32x32xf32>
      %58 = arith.mulf %57, %51 : vector<32x32xf32>
      %59 = arith.addf %48, %58 : vector<32x32xf32>
      %c0_35 = arith.constant 0 : index
      %c0_36 = arith.constant 0 : index
      %60 = vector.load %arg10[%c0_35, %c0_36] : memref<1x32xf32, #tpu.memory_space<vmem>>, vector<1x32xf32>
      %61 = vector.broadcast %60 : vector<1x32xf32> to vector<32x32xf32>
      %62 = arith.mulf %61, %51 : vector<32x32xf32>
      %63 = arith.addf %48, %62 : vector<32x32xf32>
      %c0_37 = arith.constant 0 : index
      %c0_38 = arith.constant 0 : index
      %64 = vector.load %arg13[%c0_37, %c0_38] : memref<32x32xf32, #tpu.memory_space<vmem>>, vector<32x32xf32>
      %cst_39 = arith.constant dense<0.000000e+00> : vector<32x32xf32>
      %65 = tpu.matmul %55, %64, %cst_39 {dimension_numbers = #tpu.dot_dimension_numbers<[1], [0], [0], [1], [0, 0, 1, 1], [], []>} : vector<32x32xf32>, vector<32x32xf32>, vector<32x32xf32> -> vector<32x32xf32>
      %c0_40 = arith.constant 0 : index
      %c0_41 = arith.constant 0 : index
      %66 = vector.load %arg23[%c0_40, %c0_41] : memref<32x32xf32, #tpu.memory_space<vmem>>, vector<32x32xf32>
      tpu.vector_store %arg23[%c0_40, %c0_41], %65 {strides = array<i32>} : memref<32x32xf32, #tpu.memory_space<vmem>>, vector<32x32xf32>,
      %c0_42 = arith.constant 0 : index
      %c0_43 = arith.constant 0 : index
      %67 = vector.load %arg14[%c0_42, %c0_43] : memref<32x32xf32, #tpu.memory_space<vmem>>, vector<32x32xf32>
      %cst_44 = arith.constant dense<0.000000e+00> : vector<32x32xf32>
      %68 = tpu.matmul %59, %67, %cst_44 {dimension_numbers = #tpu.dot_dimension_numbers<[1], [0], [0], [1], [0, 0, 1, 1], [], []>} : vector<32x32xf32>, vector<32x32xf32>, vector<32x32xf32> -> vector<32x32xf32>
      %c0_45 = arith.constant 0 : index
      %c0_46 = arith.constant 0 : index
      %69 = vector.load %arg24[%c0_45, %c0_46] : memref<32x32xf32, #tpu.memory_space<vmem>>, vector<32x32xf32>
      tpu.vector_store %arg24[%c0_45, %c0_46], %68 {strides = array<i32>} : memref<32x32xf32, #tpu.memory_space<vmem>>, vector<32x32xf32>,
      %c0_47 = arith.constant 0 : index
      %c0_48 = arith.constant 0 : index
      %70 = vector.load %arg15[%c0_47, %c0_48] : memref<32x32xf32, #tpu.memory_space<vmem>>, vector<32x32xf32>
      %cst_49 = arith.constant dense<0.000000e+00> : vector<32x32xf32>
      %71 = tpu.matmul %63, %70, %cst_49 {dimension_numbers = #tpu.dot_dimension_numbers<[1], [0], [0], [1], [0, 0, 1, 1], [], []>} : vector<32x32xf32>, vector<32x32xf32>, vector<32x32xf32> -> vector<32x32xf32>
      %72 = arith.negf %71 : vector<32x32xf32>
      %73 = math.exp %72 : vector<32x32xf32>
      %cst_50 = arith.constant 1.000000e+00 : f32
      %74 = vector.broadcast %cst_50 : f32 to vector<32x32xf32>
      %75 = arith.addf %74, %73 : vector<32x32xf32>
      %76 = arith.divf %74, %75 : vector<32x32xf32>
      %c0_51 = arith.constant 0 : index
      %c0_52 = arith.constant 0 : index
      %77 = vector.load %arg11[%c0_51, %c0_52] : memref<1x32xf32, #tpu.memory_space<vmem>>, vector<1x32xf32>
      %78 = math.exp %77 : vector<1x32xf32>
      %cst_53 = arith.constant 0.000000e+00 : f32
      %79 = vector.broadcast %cst_53 : f32 to vector<1x32xf32>
      %80 = arith.subf %79, %78 : vector<1x32xf32>
      %81 = vector.shape_cast %80 : vector<1x32xf32> to vector<1x32xf32>
      %82 = vector.broadcast %81 : vector<1x32xf32> to vector<8x32xf32>
      %c0_54 = arith.constant 0 : index
      %c0_55 = arith.constant 0 : index
      %83 = vector.load %arg12[%c0_54, %c0_55] : memref<1x32xf32, #tpu.memory_space<vmem>>, vector<1x32xf32>
      %84 = vector.shape_cast %83 : vector<1x32xf32> to vector<1x32xf32>
      %85 = vector.broadcast %84 : vector<1x32xf32> to vector<8x32xf32>
      %c0_56 = arith.constant 0 : index
      %c0_57 = arith.constant 0 : index
      %86 = vector.load %arg27[%c0_56, %c0_57] : memref<8x32xf32, #tpu.memory_space<vmem>>, vector<8x32xf32>
      %c0_58 = arith.constant 0 : index
      %c0_59 = arith.constant 0 : index
      %87 = vector.load %arg28[%c0_58, %c0_59] : memref<8x32xf32, #tpu.memory_space<vmem>>, vector<8x32xf32>
      %c0_60 = arith.constant 0 : index
      %c0_61 = arith.constant 0 : index
      %88 = vector.load %arg29[%c0_60, %c0_61] : memref<8x32xf32, #tpu.memory_space<vmem>>, vector<8x32xf32>
      %c0_i32_62 = arith.constant 0 : i32
      %c4_i32 = arith.constant 4 : i32
      %89 = arith.muli %c0_i32_62, %c4_i32 : i32
      %c0_i32_63 = arith.constant 0 : i32
      %90 = arith.addi %89, %c0_i32_63 : i32
      %c8_i32 = arith.constant 8 : i32
      %91 = arith.muli %90, %c8_i32 : i32
      %92 = tpu.assume_multiple %91, 8 : i32
      %93 = arith.index_cast %92 : i32 to index
      %c0_64 = arith.constant 0 : index
      %94 = vector.load %arg23[%93, %c0_64] : memref<32x32xf32, #tpu.memory_space<vmem>>, vector<8x32xf32>
      %95 = arith.index_cast %92 : i32 to index
      %c0_65 = arith.constant 0 : index
      %96 = vector.load %arg24[%95, %c0_65] : memref<32x32xf32, #tpu.memory_space<vmem>>, vector<8x32xf32>
      %97 = arith.addf %94, %85 : vector<8x32xf32>
      %98 = arith.maximumf %88, %97 : vector<8x32xf32>
      %99 = arith.subf %88, %98 : vector<8x32xf32>
      %100 = math.exp %99 : vector<8x32xf32>
      %101 = arith.subf %97, %98 : vector<8x32xf32>
      %102 = math.exp %101 : vector<8x32xf32>
      %103 = arith.mulf %100, %86 : vector<8x32xf32>
      %104 = arith.mulf %102, %96 : vector<8x32xf32>
      %105 = arith.addf %103, %104 : vector<8x32xf32>
      %106 = arith.index_cast %92 : i32 to index
      %c0_66 = arith.constant 0 : index
      %107 = vector.load %arg25[%106, %c0_66] : memref<32x32xf32, #tpu.memory_space<vmem>>, vector<8x32xf32>
      tpu.vector_store %arg25[%106, %c0_66], %105 {strides = array<i32>} : memref<32x32xf32, #tpu.memory_space<vmem>>, vector<8x32xf32>,
      %108 = arith.mulf %100, %87 : vector<8x32xf32>
      %109 = arith.addf %108, %102 : vector<8x32xf32>
      %110 = arith.index_cast %92 : i32 to index
      %c0_67 = arith.constant 0 : index
      %111 = vector.load %arg26[%110, %c0_67] : memref<32x32xf32, #tpu.memory_space<vmem>>, vector<8x32xf32>
      tpu.vector_store %arg26[%110, %c0_67], %109 {strides = array<i32>} : memref<32x32xf32, #tpu.memory_space<vmem>>, vector<8x32xf32>,
      %112 = arith.addf %88, %82 : vector<8x32xf32>
      %113 = arith.maximumf %112, %94 : vector<8x32xf32>
      %114 = arith.subf %112, %113 : vector<8x32xf32>
      %115 = math.exp %114 : vector<8x32xf32>
      %116 = arith.subf %94, %113 : vector<8x32xf32>
      %117 = math.exp %116 : vector<8x32xf32>
      %118 = arith.mulf %115, %86 : vector<8x32xf32>
      %119 = arith.mulf %117, %96 : vector<8x32xf32>
      %120 = arith.addf %118, %119 : vector<8x32xf32>
      %121 = arith.mulf %115, %87 : vector<8x32xf32>
      %122 = arith.addf %121, %117 : vector<8x32xf32>
      %c4_i32_68 = arith.constant 4 : i32
      %123 = arith.muli %c0_i32_62, %c4_i32_68 : i32
      %c1_i32_69 = arith.constant 1 : i32
      %124 = arith.addi %123, %c1_i32_69 : i32
      %c8_i32_70 = arith.constant 8 : i32
      %125 = arith.muli %124, %c8_i32_70 : i32
      %126 = tpu.assume_multiple %125, 8 : i32
      %127 = arith.index_cast %126 : i32 to index
      %c0_71 = arith.constant 0 : index
      %128 = vector.load %arg23[%127, %c0_71] : memref<32x32xf32, #tpu.memory_space<vmem>>, vector<8x32xf32>
      %129 = arith.index_cast %126 : i32 to index
      %c0_72 = arith.constant 0 : index
      %130 = vector.load %arg24[%129, %c0_72] : memref<32x32xf32, #tpu.memory_space<vmem>>, vector<8x32xf32>
      %131 = arith.addf %128, %85 : vector<8x32xf32>
      %132 = arith.maximumf %113, %131 : vector<8x32xf32>
      %133 = arith.subf %113, %132 : vector<8x32xf32>
      %134 = math.exp %133 : vector<8x32xf32>
      %135 = arith.subf %131, %132 : vector<8x32xf32>
      %136 = math.exp %135 : vector<8x32xf32>
      %137 = arith.mulf %134, %120 : vector<8x32xf32>
      %138 = arith.mulf %136, %130 : vector<8x32xf32>
      %139 = arith.addf %137, %138 : vector<8x32xf32>
      %140 = arith.index_cast %126 : i32 to index
      %c0_73 = arith.constant 0 : index
      %141 = vector.load %arg25[%140, %c0_73] : memref<32x32xf32, #tpu.memory_space<vmem>>, vector<8x32xf32>
      tpu.vector_store %arg25[%140, %c0_73], %139 {strides = array<i32>} : memref<32x32xf32, #tpu.memory_space<vmem>>, vector<8x32xf32>,
      %142 = arith.mulf %134, %122 : vector<8x32xf32>
      %143 = arith.addf %142, %136 : vector<8x32xf32>
      %144 = arith.index_cast %126 : i32 to index
      %c0_74 = arith.constant 0 : index
      %145 = vector.load %arg26[%144, %c0_74] : memref<32x32xf32, #tpu.memory_space<vmem>>, vector<8x32xf32>
      tpu.vector_store %arg26[%144, %c0_74], %143 {strides = array<i32>} : memref<32x32xf32, #tpu.memory_space<vmem>>, vector<8x32xf32>,
      %146 = arith.addf %113, %82 : vector<8x32xf32>
      %147 = arith.maximumf %146, %128 : vector<8x32xf32>
      %148 = arith.subf %146, %147 : vector<8x32xf32>
      %149 = math.exp %148 : vector<8x32xf32>
      %150 = arith.subf %128, %147 : vector<8x32xf32>
      %151 = math.exp %150 : vector<8x32xf32>
      %152 = arith.mulf %149, %120 : vector<8x32xf32>
      %153 = arith.mulf %151, %130 : vector<8x32xf32>
      %154 = arith.addf %152, %153 : vector<8x32xf32>
      %155 = arith.mulf %149, %122 : vector<8x32xf32>
      %156 = arith.addf %155, %151 : vector<8x32xf32>
      %c4_i32_75 = arith.constant 4 : i32
      %157 = arith.muli %c0_i32_62, %c4_i32_75 : i32
      %c2_i32 = arith.constant 2 : i32
      %158 = arith.addi %157, %c2_i32 : i32
      %c8_i32_76 = arith.constant 8 : i32
      %159 = arith.muli %158, %c8_i32_76 : i32
      %160 = tpu.assume_multiple %159, 8 : i32
      %161 = arith.index_cast %160 : i32 to index
      %c0_77 = arith.constant 0 : index
      %162 = vector.load %arg23[%161, %c0_77] : memref<32x32xf32, #tpu.memory_space<vmem>>, vector<8x32xf32>
      %163 = arith.index_cast %160 : i32 to index
      %c0_78 = arith.constant 0 : index
      %164 = vector.load %arg24[%163, %c0_78] : memref<32x32xf32, #tpu.memory_space<vmem>>, vector<8x32xf32>
      %165 = arith.addf %162, %85 : vector<8x32xf32>
      %166 = arith.maximumf %147, %165 : vector<8x32xf32>
      %167 = arith.subf %147, %166 : vector<8x32xf32>
      %168 = math.exp %167 : vector<8x32xf32>
      %169 = arith.subf %165, %166 : vector<8x32xf32>
      %170 = math.exp %169 : vector<8x32xf32>
      %171 = arith.mulf %168, %154 : vector<8x32xf32>
      %172 = arith.mulf %170, %164 : vector<8x32xf32>
      %173 = arith.addf %171, %172 : vector<8x32xf32>
      %174 = arith.index_cast %160 : i32 to index
      %c0_79 = arith.constant 0 : index
      %175 = vector.load %arg25[%174, %c0_79] : memref<32x32xf32, #tpu.memory_space<vmem>>, vector<8x32xf32>
      tpu.vector_store %arg25[%174, %c0_79], %173 {strides = array<i32>} : memref<32x32xf32, #tpu.memory_space<vmem>>, vector<8x32xf32>,
      %176 = arith.mulf %168, %156 : vector<8x32xf32>
      %177 = arith.addf %176, %170 : vector<8x32xf32>
      %178 = arith.index_cast %160 : i32 to index
      %c0_80 = arith.constant 0 : index
      %179 = vector.load %arg26[%178, %c0_80] : memref<32x32xf32, #tpu.memory_space<vmem>>, vector<8x32xf32>
      tpu.vector_store %arg26[%178, %c0_80], %177 {strides = array<i32>} : memref<32x32xf32, #tpu.memory_space<vmem>>, vector<8x32xf32>,
      %180 = arith.addf %147, %82 : vector<8x32xf32>
      %181 = arith.maximumf %180, %162 : vector<8x32xf32>
      %182 = arith.subf %180, %181 : vector<8x32xf32>
      %183 = math.exp %182 : vector<8x32xf32>
      %184 = arith.subf %162, %181 : vector<8x32xf32>
      %185 = math.exp %184 : vector<8x32xf32>
      %186 = arith.mulf %183, %154 : vector<8x32xf32>
      %187 = arith.mulf %185, %164 : vector<8x32xf32>
      %188 = arith.addf %186, %187 : vector<8x32xf32>
      %189 = arith.mulf %183, %156 : vector<8x32xf32>
      %190 = arith.addf %189, %185 : vector<8x32xf32>
      %c4_i32_81 = arith.constant 4 : i32
      %191 = arith.muli %c0_i32_62, %c4_i32_81 : i32
      %c3_i32 = arith.constant 3 : i32
      %192 = arith.addi %191, %c3_i32 : i32
      %c8_i32_82 = arith.constant 8 : i32
      %193 = arith.muli %192, %c8_i32_82 : i32
      %194 = tpu.assume_multiple %193, 8 : i32
      %195 = arith.index_cast %194 : i32 to index
      %c0_83 = arith.constant 0 : index
      %196 = vector.load %arg23[%195, %c0_83] : memref<32x32xf32, #tpu.memory_space<vmem>>, vector<8x32xf32>
      %197 = arith.index_cast %194 : i32 to index
      %c0_84 = arith.constant 0 : index
      %198 = vector.load %arg24[%197, %c0_84] : memref<32x32xf32, #tpu.memory_space<vmem>>, vector<8x32xf32>
      %199 = arith.addf %196, %85 : vector<8x32xf32>
      %200 = arith.maximumf %181, %199 : vector<8x32xf32>
      %201 = arith.subf %181, %200 : vector<8x32xf32>
      %202 = math.exp %201 : vector<8x32xf32>
      %203 = arith.subf %199, %200 : vector<8x32xf32>
      %204 = math.exp %203 : vector<8x32xf32>
      %205 = arith.mulf %202, %188 : vector<8x32xf32>
      %206 = arith.mulf %204, %198 : vector<8x32xf32>
      %207 = arith.addf %205, %206 : vector<8x32xf32>
      %208 = arith.index_cast %194 : i32 to index
      %c0_85 = arith.constant 0 : index
      %209 = vector.load %arg25[%208, %c0_85] : memref<32x32xf32, #tpu.memory_space<vmem>>, vector<8x32xf32>
      tpu.vector_store %arg25[%208, %c0_85], %207 {strides = array<i32>} : memref<32x32xf32, #tpu.memory_space<vmem>>, vector<8x32xf32>,
      %210 = arith.mulf %202, %190 : vector<8x32xf32>
      %211 = arith.addf %210, %204 : vector<8x32xf32>
      %212 = arith.index_cast %194 : i32 to index
      %c0_86 = arith.constant 0 : index
      %213 = vector.load %arg26[%212, %c0_86] : memref<32x32xf32, #tpu.memory_space<vmem>>, vector<8x32xf32>
      tpu.vector_store %arg26[%212, %c0_86], %211 {strides = array<i32>} : memref<32x32xf32, #tpu.memory_space<vmem>>, vector<8x32xf32>,
      %214 = arith.addf %181, %82 : vector<8x32xf32>
      %215 = arith.maximumf %214, %196 : vector<8x32xf32>
      %216 = arith.subf %214, %215 : vector<8x32xf32>
      %217 = math.exp %216 : vector<8x32xf32>
      %218 = arith.subf %196, %215 : vector<8x32xf32>
      %219 = math.exp %218 : vector<8x32xf32>
      %220 = arith.mulf %217, %188 : vector<8x32xf32>
      %221 = arith.mulf %219, %198 : vector<8x32xf32>
      %222 = arith.addf %220, %221 : vector<8x32xf32>
      %223 = arith.mulf %217, %190 : vector<8x32xf32>
      %224 = arith.addf %223, %219 : vector<8x32xf32>
      %c1_i32_87 = arith.constant 1 : i32
      %c0_88 = arith.constant 0 : index
      %c0_89 = arith.constant 0 : index
      %225 = vector.load %arg27[%c0_88, %c0_89] : memref<8x32xf32, #tpu.memory_space<vmem>>, vector<8x32xf32>
      tpu.vector_store %arg27[%c0_88, %c0_89], %222 {strides = array<i32>} : memref<8x32xf32, #tpu.memory_space<vmem>>, vector<8x32xf32>,
      %c0_90 = arith.constant 0 : index
      %c0_91 = arith.constant 0 : index
      %226 = vector.load %arg28[%c0_90, %c0_91] : memref<8x32xf32, #tpu.memory_space<vmem>>, vector<8x32xf32>
      tpu.vector_store %arg28[%c0_90, %c0_91], %224 {strides = array<i32>} : memref<8x32xf32, #tpu.memory_space<vmem>>, vector<8x32xf32>,
      %c0_92 = arith.constant 0 : index
      %c0_93 = arith.constant 0 : index
      %227 = vector.load %arg29[%c0_92, %c0_93] : memref<8x32xf32, #tpu.memory_space<vmem>>, vector<8x32xf32>
      tpu.vector_store %arg29[%c0_92, %c0_93], %215 {strides = array<i32>} : memref<8x32xf32, #tpu.memory_space<vmem>>, vector<8x32xf32>,
      %c0_94 = arith.constant 0 : index
      %c0_95 = arith.constant 0 : index
      %228 = vector.load %arg25[%c0_94, %c0_95] : memref<32x32xf32, #tpu.memory_space<vmem>>, vector<32x32xf32>
      %c0_96 = arith.constant 0 : index
      %c0_97 = arith.constant 0 : index
      %229 = vector.load %arg26[%c0_96, %c0_97] : memref<32x32xf32, #tpu.memory_space<vmem>>, vector<32x32xf32>
      %230 = tpu.reciprocal %229 : vector<32x32xf32> -> vector<32x32xf32>
      %231 = arith.mulf %228, %230 : vector<32x32xf32>
      %232 = arith.mulf %76, %231 : vector<32x32xf32>
      %c0_98 = arith.constant 0 : index
      %c0_99 = arith.constant 0 : index
      %233 = vector.load %arg16[%c0_98, %c0_99] : memref<32x32xf32, #tpu.memory_space<vmem>>, vector<32x32xf32>
      %cst_100 = arith.constant dense<0.000000e+00> : vector<32x32xf32>
      %234 = tpu.matmul %232, %233, %cst_100 {dimension_numbers = #tpu.dot_dimension_numbers<[1], [0], [0], [1], [0, 0, 1, 1], [], []>} : vector<32x32xf32>, vector<32x32xf32>, vector<32x32xf32> -> vector<32x32xf32>
      %235 = arith.addf %21, %234 : vector<32x32xf32>
      %c0_101 = arith.constant 0 : index
      %c0_102 = arith.constant 0 : index
      %236 = vector.load %arg32[%c0_101, %c0_102] : memref<32x32xf32, #tpu.memory_space<vmem>>, vector<32x32xf32>
      tpu.vector_store %arg32[%c0_101, %c0_102], %235 {strides = array<i32>} : memref<32x32xf32, #tpu.memory_space<vmem>>, vector<32x32xf32>,
      %c0_103 = arith.constant 0 : index
      %c0_104 = arith.constant 0 : index
      %237 = vector.load %arg6[%c0_103, %c0_104] : memref<1x32xf32, #tpu.memory_space<vmem>>, vector<1x32xf32>
      %c0_105 = arith.constant 0 : index
      %c0_106 = arith.constant 0 : index
      %238 = vector.load %arg7[%c0_105, %c0_106] : memref<1x32xf32, #tpu.memory_space<vmem>>, vector<1x32xf32>
      %cst_107 = arith.constant dense<0.000000e+00> : vector<32xf32>
      %239 = vector.multi_reduction <add>, %235, %cst_107 [1] : vector<32x32xf32> to vector<32xf32>
      %240 = vector.shape_cast %239 : vector<32xf32> to vector<32x1xf32>
      %cst_108 = arith.constant 3.200000e+01 : f32
      %241 = vector.broadcast %cst_108 : f32 to vector<32x1xf32>
      %242 = arith.divf %240, %241 : vector<32x1xf32>
      %243 = vector.broadcast %242 : vector<32x1xf32> to vector<32x32xf32>
      %244 = arith.subf %235, %243 : vector<32x32xf32>
      %245 = arith.mulf %244, %244 : vector<32x32xf32>
      %cst_109 = arith.constant dense<0.000000e+00> : vector<32xf32>
      %246 = vector.multi_reduction <add>, %245, %cst_109 [1] : vector<32x32xf32> to vector<32xf32>
      %247 = vector.shape_cast %246 : vector<32xf32> to vector<32x1xf32>
      %cst_110 = arith.constant 3.200000e+01 : f32
      %248 = vector.broadcast %cst_110 : f32 to vector<32x1xf32>
      %249 = arith.divf %247, %248 : vector<32x1xf32>
      %250 = vector.broadcast %242 : vector<32x1xf32> to vector<32x32xf32>
      %251 = arith.subf %235, %250 : vector<32x32xf32>
      %cst_111 = arith.constant 9.99999974E-6 : f32
      %252 = vector.broadcast %cst_111 : f32 to vector<32x1xf32>
      %253 = arith.addf %249, %252 : vector<32x1xf32>
      %254 = math.rsqrt %253 : vector<32x1xf32>
      %255 = vector.broadcast %254 : vector<32x1xf32> to vector<32x32xf32>
      %256 = arith.mulf %251, %255 : vector<32x32xf32>
      %257 = vector.broadcast %237 : vector<1x32xf32> to vector<32x32xf32>
      %258 = arith.mulf %256, %257 : vector<32x32xf32>
      %259 = vector.broadcast %238 : vector<1x32xf32> to vector<32x32xf32>
      %260 = arith.addf %258, %259 : vector<32x32xf32>
      %c0_112 = arith.constant 0 : index
      %c0_113 = arith.constant 0 : index
      %261 = vector.load %arg31[%c0_112, %c0_113] : memref<8x32xf32, #tpu.memory_space<vmem>>, vector<8x32xf32>
      %262 = vector.extract_strided_slice %260 {offsets = [0, 0], sizes = [24, 32], strides = [1, 1]} : vector<32x32xf32> to vector<24x32xf32>
      %263 = tpu.concatenate %261, %262 in 0 : vector<8x32xf32>, vector<24x32xf32> -> vector<32x32xf32>
      %264 = vector.extract_strided_slice %260 {offsets = [24, 0], sizes = [8, 32], strides = [1, 1]} : vector<32x32xf32> to vector<8x32xf32>
      %c0_114 = arith.constant 0 : index
      %c0_115 = arith.constant 0 : index
      %265 = vector.load %arg31[%c0_114, %c0_115] : memref<8x32xf32, #tpu.memory_space<vmem>>, vector<8x32xf32>
      tpu.vector_store %arg31[%c0_114, %c0_115], %264 {strides = array<i32>} : memref<8x32xf32, #tpu.memory_space<vmem>>, vector<8x32xf32>,
      %266 = arith.subf %260, %263 : vector<32x32xf32>
      %c0_116 = arith.constant 0 : index
      %c0_117 = arith.constant 0 : index
      %267 = vector.load %arg17[%c0_116, %c0_117] : memref<1x32xf32, #tpu.memory_space<vmem>>, vector<1x32xf32>
      %268 = vector.broadcast %267 : vector<1x32xf32> to vector<32x32xf32>
      %269 = arith.mulf %268, %266 : vector<32x32xf32>
      %270 = arith.addf %263, %269 : vector<32x32xf32>
      %c0_118 = arith.constant 0 : index
      %c0_119 = arith.constant 0 : index
      %271 = vector.load %arg33[%c0_118, %c0_119] : memref<32x32xf32, #tpu.memory_space<vmem>>, vector<32x32xf32>
      tpu.vector_store %arg33[%c0_118, %c0_119], %270 {strides = array<i32>} : memref<32x32xf32, #tpu.memory_space<vmem>>, vector<32x32xf32>,
      %c0_120 = arith.constant 0 : index
      %c0_121 = arith.constant 0 : index
      %272 = vector.load %arg18[%c0_120, %c0_121] : memref<1x32xf32, #tpu.memory_space<vmem>>, vector<1x32xf32>
      %273 = vector.broadcast %272 : vector<1x32xf32> to vector<32x32xf32>
      %274 = arith.mulf %273, %266 : vector<32x32xf32>
      %275 = arith.addf %263, %274 : vector<32x32xf32>
      %c0_122 = arith.constant 0 : index
      %c0_123 = arith.constant 0 : index
      %276 = vector.load %arg20[%c0_122, %c0_123] : memref<32x32xf32, #tpu.memory_space<vmem>>, vector<32x32xf32>
      %cst_124 = arith.constant dense<0.000000e+00> : vector<32x32xf32>
      %277 = tpu.matmul %275, %276, %cst_124 {dimension_numbers = #tpu.dot_dimension_numbers<[1], [0], [0], [1], [0, 0, 1, 1], [], []>} : vector<32x32xf32>, vector<32x32xf32>, vector<32x32xf32> -> vector<32x32xf32>
      %278 = arith.negf %277 : vector<32x32xf32>
      %279 = math.exp %278 : vector<32x32xf32>
      %cst_125 = arith.constant 1.000000e+00 : f32
      %280 = vector.broadcast %cst_125 : f32 to vector<32x32xf32>
      %281 = arith.addf %280, %279 : vector<32x32xf32>
      %282 = arith.divf %280, %281 : vector<32x32xf32>
      %c0_126 = arith.constant 0 : index
      %c0_127 = arith.constant 0 : index
      %283 = vector.load %arg34[%c0_126, %c0_127] : memref<32x32xf32, #tpu.memory_space<vmem>>, vector<32x32xf32>
      tpu.vector_store %arg34[%c0_126, %c0_127], %282 {strides = array<i32>} : memref<32x32xf32, #tpu.memory_space<vmem>>, vector<32x32xf32>,
      %cst_128 = arith.constant 0.000000e+00 : f32
      %284 = vector.broadcast %cst_128 : f32 to vector<32x32xf32>
      %c0_129 = arith.constant 0 : index
      %c0_130 = arith.constant 0 : index
      %285 = vector.load %arg35[%c0_129, %c0_130] : memref<32x32xf32, #tpu.memory_space<vmem>>, vector<32x32xf32>
      tpu.vector_store %arg35[%c0_129, %c0_130], %284 {strides = array<i32>} : memref<32x32xf32, #tpu.memory_space<vmem>>, vector<32x32xf32>,
    } else {
    }
    %c0 = arith.constant 0 : index
    %c0_1 = arith.constant 0 : index
    %3 = vector.load %arg33[%c0, %c0_1] : memref<32x32xf32, #tpu.memory_space<vmem>>, vector<32x32xf32>
    %c0_2 = arith.constant 0 : index
    %c0_3 = arith.constant 0 : index
    %4 = vector.load %arg19[%c0_2, %c0_3] : memref<32x128xf32, #tpu.memory_space<vmem>>, vector<32x128xf32>
    %cst = arith.constant dense<0.000000e+00> : vector<32x128xf32>
    %5 = tpu.matmul %3, %4, %cst {dimension_numbers = #tpu.dot_dimension_numbers<[1], [0], [0], [1], [0, 0, 1, 1], [], []>} : vector<32x32xf32>, vector<32x128xf32>, vector<32x128xf32> -> vector<32x128xf32>
    %cst_4 = arith.constant 0.000000e+00 : f32
    %6 = vector.broadcast %cst_4 : f32 to vector<32x128xf32>
    %7 = arith.maximumf %5, %6 : vector<32x128xf32>
    %8 = arith.mulf %7, %7 : vector<32x128xf32>
    %c0_5 = arith.constant 0 : index
    %c0_6 = arith.constant 0 : index
    %9 = vector.load %arg35[%c0_5, %c0_6] : memref<32x32xf32, #tpu.memory_space<vmem>>, vector<32x32xf32>
    %c0_7 = arith.constant 0 : index
    %c0_8 = arith.constant 0 : index
    %10 = vector.load %arg21[%c0_7, %c0_8] : memref<128x32xf32, #tpu.memory_space<vmem>>, vector<128x32xf32>
    %cst_9 = arith.constant dense<0.000000e+00> : vector<32x32xf32>
    %11 = tpu.matmul %8, %10, %cst_9 {dimension_numbers = #tpu.dot_dimension_numbers<[1], [0], [0], [1], [0, 0, 1, 1], [], []>} : vector<32x128xf32>, vector<128x32xf32>, vector<32x32xf32> -> vector<32x32xf32>
    %12 = arith.addf %9, %11 : vector<32x32xf32>
    %c0_10 = arith.constant 0 : index
    %c0_11 = arith.constant 0 : index
    %13 = vector.load %arg35[%c0_10, %c0_11] : memref<32x32xf32, #tpu.memory_space<vmem>>, vector<32x32xf32>
    tpu.vector_store %arg35[%c0_10, %c0_11], %12 {strides = array<i32>} : memref<32x32xf32, #tpu.memory_space<vmem>>, vector<32x32xf32>,
    %c1_i32 = arith.constant 1 : i32
    %14 = arith.cmpi eq, %arg2, %c1_i32 : i32
    %15 = arith.extui %14 : i1 to i32
    %c0_i32_12 = arith.constant 0 : i32
    %16 = arith.cmpi ne, %15, %c0_i32_12 : i32
    scf.if %16 {
      %c0_13 = arith.constant 0 : index
      %c0_14 = arith.constant 0 : index
      %17 = vector.load %arg32[%c0_13, %c0_14] : memref<32x32xf32, #tpu.memory_space<vmem>>, vector<32x32xf32>
      %c0_15 = arith.constant 0 : index
      %c0_16 = arith.constant 0 : index
      %18 = vector.load %arg34[%c0_15, %c0_16] : memref<32x32xf32, #tpu.memory_space<vmem>>, vector<32x32xf32>
      %c0_17 = arith.constant 0 : index
      %c0_18 = arith.constant 0 : index
      %19 = vector.load %arg35[%c0_17, %c0_18] : memref<32x32xf32, #tpu.memory_space<vmem>>, vector<32x32xf32>
      %20 = arith.mulf %18, %19 : vector<32x32xf32>
      %21 = arith.addf %17, %20 : vector<32x32xf32>
      %c0_19 = arith.constant 0 : index
      %c0_20 = arith.constant 0 : index
      %c0_21 = arith.constant 0 : index
      %22 = vector.load %arg22[%c0_19, %c0_20, %c0_21] : memref<1x32x32xf32, #tpu.memory_space<vmem>>, vector<1x32x32xf32>
      %23 = vector.shape_cast %22 : vector<1x32x32xf32> to vector<32x32xf32>
      %24 = vector.shape_cast %21 : vector<32x32xf32> to vector<1x32x32xf32>
      tpu.vector_store %arg22[%c0_19, %c0_20, %c0_21], %24 {strides = array<i32>} : memref<1x32x32xf32, #tpu.memory_space<vmem>>, vector<1x32x32xf32>,
    } else {
    }
    return
  }
  func.func @transform_0(%arg0: i32, %arg1: i32, %arg2: i32) -> (i32, i32, i32) {
    %c0_i32 = arith.constant 0 : i32
    %c0_i32_0 = arith.constant 0 : i32
    return %arg0, %arg1, %c0_i32 : i32, i32, i32
  }
  func.func @transform_1(%arg0: i32, %arg1: i32, %arg2: i32) -> (i32, i32) {
    %c0_i32 = arith.constant 0 : i32
    %c0_i32_0 = arith.constant 0 : i32
    %c0_i32_1 = arith.constant 0 : i32
    return %c0_i32, %c0_i32_0 : i32, i32
  }
  func.func @transform_2(%arg0: i32, %arg1: i32, %arg2: i32) -> (i32, i32) {
    %c0_i32 = arith.constant 0 : i32
    %c0_i32_0 = arith.constant 0 : i32
    %c0_i32_1 = arith.constant 0 : i32
    return %c0_i32, %c0_i32_0 : i32, i32
  }
  func.func @transform_3(%arg0: i32, %arg1: i32, %arg2: i32) -> (i32, i32) {
    %c0_i32 = arith.constant 0 : i32
    %c0_i32_0 = arith.constant 0 : i32
    %c0_i32_1 = arith.constant 0 : i32
    return %c0_i32, %c0_i32_0 : i32, i32
  }
  func.func @transform_4(%arg0: i32, %arg1: i32, %arg2: i32) -> (i32, i32) {
    %c0_i32 = arith.constant 0 : i32
    %c0_i32_0 = arith.constant 0 : i32
    %c0_i32_1 = arith.constant 0 : i32
    return %c0_i32, %c0_i32_0 : i32, i32
  }
  func.func @transform_5(%arg0: i32, %arg1: i32, %arg2: i32) -> (i32, i32) {
    %c0_i32 = arith.constant 0 : i32
    %c0_i32_0 = arith.constant 0 : i32
    %c0_i32_1 = arith.constant 0 : i32
    return %c0_i32, %c0_i32_0 : i32, i32
  }
  func.func @transform_6(%arg0: i32, %arg1: i32, %arg2: i32) -> (i32, i32) {
    %c0_i32 = arith.constant 0 : i32
    %c0_i32_0 = arith.constant 0 : i32
    %c0_i32_1 = arith.constant 0 : i32
    return %c0_i32, %c0_i32_0 : i32, i32
  }
  func.func @transform_7(%arg0: i32, %arg1: i32, %arg2: i32) -> (i32, i32) {
    %c0_i32 = arith.constant 0 : i32
    %c0_i32_0 = arith.constant 0 : i32
    %c0_i32_1 = arith.constant 0 : i32
    return %c0_i32, %c0_i32_0 : i32, i32
  }
  func.func @transform_8(%arg0: i32, %arg1: i32, %arg2: i32) -> (i32, i32) {
    %c0_i32 = arith.constant 0 : i32
    %c0_i32_0 = arith.constant 0 : i32
    %c0_i32_1 = arith.constant 0 : i32
    return %c0_i32, %c0_i32_0 : i32, i32
  }
  func.func @transform_9(%arg0: i32, %arg1: i32, %arg2: i32) -> (i32, i32) {
    %c0_i32 = arith.constant 0 : i32
    %c0_i32_0 = arith.constant 0 : i32
    %c0_i32_1 = arith.constant 0 : i32
    return %c0_i32, %c0_i32_0 : i32, i32
  }
  func.func @transform_10(%arg0: i32, %arg1: i32, %arg2: i32) -> (i32, i32) {
    %c0_i32 = arith.constant 0 : i32
    %c0_i32_0 = arith.constant 0 : i32
    %c0_i32_1 = arith.constant 0 : i32
    return %c0_i32, %c0_i32_0 : i32, i32
  }
  func.func @transform_11(%arg0: i32, %arg1: i32, %arg2: i32) -> (i32, i32) {
    %c0_i32 = arith.constant 0 : i32
    %c0_i32_0 = arith.constant 0 : i32
    %c0_i32_1 = arith.constant 0 : i32
    return %c0_i32, %c0_i32_0 : i32, i32
  }
  func.func @transform_12(%arg0: i32, %arg1: i32, %arg2: i32) -> (i32, i32) {
    %c0_i32 = arith.constant 0 : i32
    %c0_i32_0 = arith.constant 0 : i32
    %c0_i32_1 = arith.constant 0 : i32
    return %c0_i32, %c0_i32_0 : i32, i32
  }
  func.func @transform_13(%arg0: i32, %arg1: i32, %arg2: i32) -> (i32, i32) {
    %c0_i32 = arith.constant 0 : i32
    %c0_i32_0 = arith.constant 0 : i32
    %c0_i32_1 = arith.constant 0 : i32
    return %c0_i32, %c0_i32_0 : i32, i32
  }
  func.func @transform_14(%arg0: i32, %arg1: i32, %arg2: i32) -> (i32, i32) {
    %c0_i32 = arith.constant 0 : i32
    %c0_i32_0 = arith.constant 0 : i32
    %c0_i32_1 = arith.constant 0 : i32
    return %c0_i32, %c0_i32_0 : i32, i32
  }
  func.func @transform_15(%arg0: i32, %arg1: i32, %arg2: i32) -> (i32, i32) {
    %c0_i32 = arith.constant 0 : i32
    %c0_i32_0 = arith.constant 0 : i32
    %c0_i32_1 = arith.constant 0 : i32
    return %c0_i32, %c0_i32_0 : i32, i32
  }
  func.func @transform_16(%arg0: i32, %arg1: i32, %arg2: i32) -> (i32, i32) {
    %c0_i32 = arith.constant 0 : i32
    %c0_i32_0 = arith.constant 0 : i32
    return %c0_i32, %arg2 : i32, i32
  }
  func.func @transform_17(%arg0: i32, %arg1: i32, %arg2: i32) -> (i32, i32) {
    %c0_i32 = arith.constant 0 : i32
    %c0_i32_0 = arith.constant 0 : i32
    %c0_i32_1 = arith.constant 0 : i32
    return %c0_i32, %c0_i32_0 : i32, i32
  }
  func.func @transform_18(%arg0: i32, %arg1: i32, %arg2: i32) -> (i32, i32) {
    %c0_i32 = arith.constant 0 : i32
    %c0_i32_0 = arith.constant 0 : i32
    return %arg2, %c0_i32 : i32, i32
  }
  func.func @transform_19(%arg0: i32, %arg1: i32, %arg2: i32) -> (i32, i32, i32) {
    %c0_i32 = arith.constant 0 : i32
    %c0_i32_0 = arith.constant 0 : i32
    return %arg0, %arg1, %c0_i32 : i32, i32, i32
  }
}

</mosaic_0001>

<bundles_post_ra>
// kernel: tpu_custom_call.1
= control target key start
LH: loop header
LB: loop body
LE: loop exit
PB: predicated region body
PF: predicated region fallthrough
CT: control target
= control target key end

     0   :  { %6 = vsyncpa [#allocation3], 0  ;;  %s115_s0 = inlined_call_operand.hbm [shape: s32[8,128], index: 0, kind: input, shape index: {}]   ;;  %s116_s1 = inlined_call_operand.hbm [shape: s32[8,128], index: 1, kind: output, shape index: {}]  }
   0x1   :  { %7 = vsyncpa [#allocation4], 0  ;;  %s13_s8 = sshll.u32 %s115_s0, 4  ;;  %s97_s9 = smov [#allocation2]   ;;  %s14_s8 = int_to_ptr.hbm [resolvable:$true] %s13_s8 }
   0x2   :  { %s15_s10 = sshll.u32 %s97_s9, 4  ;;  %s16_s10 = int_to_ptr.vmem [resolvable:$true] %s15_s10 }
   0x3   :  { %18 = dma.hbm_to_vmem [thread:$0]  %s14_s8, 128, %s16_s10, [#allocation3]  }
   0x4   :  { %93 = dma.done.wait [#allocation3], 128  }
   0x5   :  { %94 = vsyncadd [#allocation3], 4294967168  ;;  %s98_s11 = smov [#allocation5]   ;;  %s33_s15 = sshll.u32 %s116_s1, 4  ;;  %v23_v0 = vld [vmem:[#allocation2] sm:$0xff]  ;;  %s34_s15 = int_to_ptr.hbm [resolvable:$true] %s33_s15 }
   0x6   :  { %s31_s12 = sshll.u32 %s98_s11, 4  ;;  %v24_v1 = vrot.slane %v23_v0, 7  ;;  %s32_s12 = int_to_ptr.vmem [resolvable:$true] %s31_s12 }
   0x8   :  { %25 = vst [vmem:[#allocation5] sm:$0xff] %v24_v1 }
   0x9   :  { %36 = dma.vmem_to_hbm [thread:$0]  %s32_s12, 128, %s34_s15, [#allocation4]  }
   0xa   :  { %95 = dma.done.wait [#allocation4], 128  }
   0xb   :  { %96 = vsyncadd [#allocation4], 4294967168 }
   0xc   :  { %41 = vsyncpa [#allocation3], 1 }
   0xd   :  { %42 = vsyncpa [#allocation4], 1 }

// kernel: tpu_custom_call.1
= control target key start
LH: loop header
LB: loop body
LE: loop exit
PB: predicated region body
PF: predicated region fallthrough
CT: control target
= control target key end

     0   :  { %s2843_s0 = inlined_call_operand.vmem [shape: f32[1,64,32], index: 0, kind: input, shape index: {}]   ;;  %s2844_s1 = inlined_call_operand.vmem [shape: f32[1,32], index: 1, kind: input, shape index: {}]   ;;  %s2845_s2 = inlined_call_operand.vmem [shape: f32[1,32], index: 2, kind: input, shape index: {}]   ;;  %s2846_s3 = inlined_call_operand.vmem [shape: f32[1,32], index: 3, kind: input, shape index: {}]   ;;  %s2847_s4 = inlined_call_operand.vmem [shape: f32[1,32], index: 4, kind: input, shape index: {}]   ;;  %s2848_s5 = inlined_call_operand.vmem [shape: f32[1,32], index: 5, kind: input, shape index: {}]   ;;  %s2849_s6 = inlined_call_operand.vmem [shape: f32[1,32], index: 6, kind: input, shape index: {}]   ;;  %s2850_s7 = inlined_call_operand.vmem [shape: f32[1,32], index: 7, kind: input, shape index: {}]   ;;  %s2851_s8 = inlined_call_operand.vmem [shape: f32[1,32], index: 8, kind: input, shape index: {}]   ;;  %s2852_s9 = inlined_call_operand.vmem [shape: f32[1,32], index: 9, kind: input, shape index: {}]   ;;  %s2853_s10 = inlined_call_operand.vmem [shape: f32[32,32], index: 10, kind: input, shape index: {}]   ;;  %s2854_s11 = inlined_call_operand.vmem [shape: f32[32,32], index: 11, kind: input, shape index: {}]   ;;  %s2855_s12 = inlined_call_operand.vmem [shape: f32[32,32], index: 12, kind: input, shape index: {}]   ;;  %s2856_s13 = inlined_call_operand.vmem [shape: f32[32,32], index: 13, kind: input, shape index: {}]   ;;  %s2857_s14 = inlined_call_operand.vmem [shape: f32[1,32], index: 14, kind: input, shape index: {}]   ;;  %s2858_s15 = inlined_call_operand.vmem [shape: f32[1,32], index: 15, kind: input, shape index: {}]   ;;  %s2859_s16 = inlined_call_operand.vmem [shape: f32[32,256], index: 16, kind: input, shape index: {}]   ;;  %s2860_s17 = inlined_call_operand.vmem [shape: f32[32,32], index: 17, kind: input, shape index: {}]   ;;  %s2861_s18 = inlined_call_operand.vmem [shape: f32[256,32], index: 18, kind: input, shape index: {}]   ;;  %s2862_s19 = inlined_call_operand.vmem [shape: f32[1,64,32], index: 19, kind: output, shape index: {}]  }
   0x1   :  { %2868 = sst [smem:[#allocation23_spill]] %s2843_s0 }
   0x2   :  { %2869 = sst [smem:[#allocation24_spill]] %s2844_s1 }
   0x3   :  { %2870 = sst [smem:[#allocation25_spill]] %s2845_s2 }
   0x4   :  { %2871 = sst [smem:[#allocation26_spill]] %s2846_s3 }
   0x5   :  { %2872 = sst [smem:[#allocation27_spill]] %s2857_s14 }
   0x6   :  { %2873 = sst [smem:[#allocation28_spill]] %s2858_s15 }
   0x7   :  { %2874 = sst [smem:[#allocation29_spill]] %s2859_s16 }
   0x8   :  { %s2357_s0 = smov 0   ;;  %s2359_s30 = smov 0  }
   0x9   :  { %s2361_s20 = smov 0   ;;  %s2363_s21 = smov 0  }
   0xa   :  { %s2365_s1 = smov 0   ;;  %s2367_s22 = smov 0  }
   0xb   :  { %s2369_s2 = smov 0  }
   0xc LB: > { %2875 = sst [smem:[#allocation16_spill]] %s2231_s30  ;;  %s41_s23 = sadd.s32 1, %s2243_s1  ;;  %s2251_s2 = sphi %s2369_s2, %s29_s2   ;;  %s2247_s22 = sphi %s2367_s22, %s2899_s22   ;;  %s2243_s1 = sphi %s2365_s1, %s2898_s1   ;;  %s2239_s21 = sphi %s2363_s21, %s2897_s21   ;;  %s2235_s20 = sphi %s2361_s20, %s2896_s20   ;;  %s2231_s30 = sphi %s2359_s30, %s2895_s30   ;;  %s2227_s0 = sphi %s2357_s0, %s2894_s0  }
   0xd   : > { %2876 = sst [smem:[#allocation17_spill]] %s2243_s1  ;;  %s44_s24 = sadd.s32 1, %s2247_s22 }
   0xe   : > { %2877 = sst [smem:[#allocation18_spill]] %s2247_s22  ;;  %p42_p0 = scmp.ge.s32.totalorder %s41_s23, 2 }
   0xf   : > { %2878 = sst [smem:[#allocation19_spill]] %s2251_s2  ;;  %s398_s25 = sadd.s32 1, %s2231_s30 }
  0x10   : > { %p405_p1 = scmp.ne.s32.totalorder %s2231_s30, %s2227_s0  ;;  %p406_p2 = scmp.eq.s32.totalorder %s2251_s2, 0 }
  0x11   : > { %s2901_s23 = smov (%p42_p0, %s41_s23), 0  ;;  %s2903_s24 = smov (!%p42_p0, %s44_s24), %s2247_s22 }
  0x12   : > { %2879 = sst [smem:[#allocation20_spill]] %s2901_s23  ;;  %s395_s3 = ssub.s32 %s2243_s1, %s2901_s23 }
  0x13   : > { %p407_p3 = por %p406_p2, %p405_p1  ;;  %p46_p4 = scmp.ge.s32.totalorder %s2903_s24, 2 }
  0x14   : > { %p396_p5 = scmp.eq.s32.totalorder %s395_s3, 0  ;;  %p1939_p6 = scmp.ge.s32.totalorder %s2251_s2, 4 }
  0x15   : > { %s2905_s24 = smov (%p46_p4, %s2903_s24), 0 }
  0x16   : > { %2880 = sst [smem:[#allocation21_spill]] %s2905_s24  ;;  %554 = sbr.rel (%p1939_p6) target bundleno = 41 (0x29), region = 80 }
  0x17   : > { %s2406_s26 = scalar_select %p396_p5, %s2231_s30, %s398_s25  }
  0x19   : > { %2881 = sst [smem:[#allocation22_spill]] %s2406_s26 }
  0x1b   : > { %570 = sbr.rel (!%p407_p3) target bundleno = 41 (0x29), region = 88  ;;  %s572_s27 = sand.u32 (%p407_p3), 1, %s2231_s30  }
  0x1c   : > { %s1941_s28 = sshll.u32 (%p407_p3), %s2243_s1, 3  ;;  %s1940_s29 = sshll.u32 (%p407_p3), %s572_s27, 5 }
  0x1d   : > { %s2882_s16 = sld [smem:[#allocation29_spill]] (%p407_p3)  ;;  %s574_s3 = scalar_lea.vmem (%p407_p3), [#allocation15], %s1940_s29 }
  0x23   : > { %s576_s23 = scalar_lea.vmem %s2882_s16, %s1941_s28 }
  0x24   : > { %v611_v0 = vld [vmem:[%s576_s23] sm:$0xff]  ;;  %v613_v1 = vld [vmem:[%s576_s23 + $0x10] sm:$0xff] }
  0x25   : > { %v615_v2 = vld [vmem:[%s576_s23 + $0x20] sm:$0xff]  ;;  %612 = vst [vmem:[%s574_s3] sm:$0xff] %v611_v0  ;;  %v617_v3 = vld [vmem:[%s576_s23 + $0x30] sm:$0xff] }
  0x26   : > { %614 = vst [vmem:[%s574_s3 + $0x8] sm:$0xff] %v613_v1 }
  0x27   : > { %616 = vst [vmem:[%s574_s3 + $0x10] sm:$0xff] %v615_v2 }
  0x28   : > { %618 = vst [vmem:[%s574_s3 + $0x18] sm:$0xff] %v617_v3 }
  0x29 PF: > { %p1942_p7 = scmp.ge.s32.totalorder %s2251_s2, 1  ;;  %p632_p8 = scmp.lt.s32.totalorder %s2251_s2, 5 }
  0x2b   : > { %p633_p9 = pnand %p1942_p7, %p632_p8 }
  0x2c   : > { %s639_s14 = sand.u32 (!%p633_p9), 1, %s2227_s0   ;;  %s1944_s15 = sshll.u32 (!%p633_p9), %s2239_s21, 2 }
  0x2d   : > { %636 = sbr.rel (%p633_p9) target bundleno = 1432 (0x598), region = 130  ;;  %s1943_s25 = sshll.u32 (!%p633_p9), %s639_s14, 5 }
  0x2e   : > { %p715_p10 = scmp.lt.s32.totalorder (!%p633_p9), %s1944_s15, 7  ;;  %s1946_s27 = sshll.u32 (!%p633_p9), %s2235_s20, 4 }
  0x2f   : > { %p723_p11 = scmp.lt.s32.totalorder (!%p633_p9), %s1946_s27, 31  ;;  %s2883_s3 = sld [smem:[#allocation23_spill]] (!%p633_p9) }
  0x30   : > { %s2434_s2 = scalar_lea.vmem (!%p633_p9), [#allocation15], %s1943_s25  ;;  %p1950_p12 = scmp.ne.s32.totalorder (!%p633_p9), %s2235_s20, 0 }
  0x32   : > { %s2907_s15 = smov (!%p715_p10, %s1944_s15), 7  ;;  %s2909_s27 = smov (!%p723_p11, %s1946_s27), 31 }
  0x33   : > { %s1945_s23 = sshll.u32 %s2907_s15, 3  ;;  %s1947_s26 = sshll.u32 %s2909_s27, 3 }
  0x34   : > { %s2427_s1 = scalar_lea.vmem %s2862_s19, %s1945_s23  ;;  %s2432_s14 = scalar_lea.vmem %s2861_s18, %s1947_s26 }
  0x35   : > { %s2422_s16 = scalar_lea.vmem %s2883_s3, %s1945_s23  ;;  %741 = sbr.rel (%p1950_p12) target bundleno = 1123 (0x463), region = 138 }
  0x36   : > { %p1951_p13 = scmp.ne.s32.totalorder (!%p1950_p12), %s2239_s21, 0 }
  0x3a   : > { %745 = sbr.rel (%p1951_p13) target bundleno = 69 (0x45), region = 142 }
  0x3f   : > { %vm746_vm0 = vcmask 261120   ;;  %v2253_v4 = vmov 0.0   ;;  %v2254_v5 = vmov -1e+38  }
  0x40   : > { %747 = vst.msk [vmem:[#allocation6] sm:$0xff] %vm746_vm0, %v2253_v4 }
  0x41   : > { %748 = vst.msk [vmem:[#allocation7] sm:$0xff] %vm746_vm0, %v2253_v4 }
  0x42   : > { %750 = vst.msk [vmem:[#allocation9] sm:$0xff] %vm746_vm0, %v2253_v4 }
  0x43   : > { %751 = vst.msk [vmem:[#allocation10] sm:$0xff] %vm746_vm0, %v2253_v4 }
  0x44   : > { %749 = vst.msk [vmem:[#allocation8] sm:$0xff] %vm746_vm0, %v2254_v5 }
  0x45 PF: > { %v754_v6 = vld [vmem:[%s2422_s16 + $0x10] sm:$0xff]  ;;  %vm758_vm1 = vcmask 261120   ;;  %v752_v7 = vld [vmem:[%s2422_s16] sm:$0xff]  ;;  %v755_v10 = vld [vmem:[%s2422_s16 + $0x18] sm:$0xff]  ;;  %v2255_v14 = vmov 32.0   ;;  %s2884_s30 = sld [smem:[#allocation24_spill]] }
  0x46   : > { %v765_v8 = vsel %vm758_vm1, %v754_v6, 0.0  ;;  %v759_v9 = vsel %vm758_vm1, %v752_v7, 0.0  ;;  %v753_v11 = vld [vmem:[%s2422_s16 + $0x8] sm:$0xff]  ;;  %v768_v12 = vsel %vm758_vm1, %v755_v10, 0.0  ;;  %2101 = vrcp.f32 %v2255_v14  ;;  %v913_v41 = vld [vmem:[%s2853_s10 + $0x18] sm:$0xff]  ;;  %v912_v42 = vld [vmem:[%s2853_s10 + $0x10] sm:$0xff] }
  0x47   : > { %766 = vadd.xlane.f32.xlu1 %v765_v8  ;;  %760 = vadd.xlane.f32.xlu0 %v759_v9  ;;  %v762_v13 = vsel %vm758_vm1, %v753_v11, 0.0  ;;  %v911_v45 = vld [vmem:[%s2853_s10 + $0x8] sm:$0xff]  ;;  %v910_v48 = vld [vmem:[%s2853_s10] sm:$0xff]  ;;  %v962_v60 = vld [vmem:[%s2854_s11 + $0x18] sm:$0xff]  ;;  %s2885_s24 = sld [smem:[#allocation25_spill]] }
  0x48   : > { %938 = vmatpush.msra.mxu0 %v913_v41  ;;  %1987 = vmatpush.msra.mxu1 %v913_v41  ;;  %v1011_v61 = vld [vmem:[%s2855_s12 + $0x18] sm:$0xff]  ;;  %v961_v62 = vld [vmem:[%s2854_s11 + $0x10] sm:$0xff]  ;;  %v960_v2 = vld [vmem:[%s2854_s11 + $0x8] sm:$0xff]  ;;  %s2890_s15 = sld [smem:[#allocation26_spill]] }
  0x49   : > { %1988 = vmatpush.msra.mxu2 %v913_v41  ;;  %1989 = vmatpush.msra.mxu3 %v913_v41  ;;  %v1010_v0 = vld [vmem:[%s2855_s12 + $0x10] sm:$0xff]  ;;  %v1009_v3 = vld [vmem:[%s2855_s12 + $0x8] sm:$0xff]  ;;  %s2891_s28 = sld [smem:[#allocation27_spill]] }
  0x4a   : > { %939 = vmatpush.msra.mxu0 %v912_v42  ;;  %1990 = vmatpush.msra.mxu1 %v912_v42  ;;  %s2892_s0 = sld [smem:[#allocation28_spill]] }
  0x4b   : > { %1991 = vmatpush.msra.mxu2 %v912_v42  ;;  %1992 = vmatpush.msra.mxu3 %v912_v42 }
  0x4c   : > { %v2102_v15 = vpop.eup %2101  ;;  %940 = vmatpush.msra.mxu0 %v911_v45  ;;  %1993 = vmatpush.msra.mxu1 %v911_v45 }
  0x4d   : > { %v772_v16 = vmul.f32 32.0, %v2102_v15  ;;  %vm776_vm2 = vweird.f32 %v2102_v15  ;;  %1994 = vmatpush.msra.mxu2 %v911_v45  ;;  %1995 = vmatpush.msra.mxu3 %v911_v45 }
  0x4e   : > { %941 = vmatpush.msra.mxu0 %v910_v48  ;;  %1996 = vmatpush.msra.mxu1 %v910_v48 }
  0x4f   : > { %769 = vadd.xlane.f32.xlu1 %v768_v12  ;;  %763 = vadd.xlane.f32.xlu0 %v762_v13  ;;  %v773_v17 = vsub.f32 1.0, %v772_v16 }
  0x50   : > { %1997 = vmatpush.msra.mxu2 %v910_v48  ;;  %1998 = vmatpush.msra.mxu3 %v910_v48 }
  0x51   : > { %v774_v18 = vmul.f32 %v2102_v15, %v773_v17  ;;  %987 = vmatpush.msrb.mxu1 %v962_v60 }
  0x52   : > { %1036 = vmatpush.msrb.mxu2 %v1011_v61 }
  0x53   : > { %v775_v19 = vadd.f32 %v2102_v15, %v774_v18  ;;  %988 = vmatpush.msrb.mxu1 %v961_v62 }
  0x54   : > { %1037 = vmatpush.msrb.mxu2 %v1010_v0 }
  0x55   : > { %v2446_v20 = vsel %vm776_vm2, %v2102_v15, %v775_v19  ;;  %989 = vmatpush.msrb.mxu1 %v960_v2  ;;  %v2091_v15 = vld [vmem:[%s2884_s30] ss:$0 sm:$0xff] }
  0x56   : > { %1038 = vmatpush.msrb.mxu2 %v1009_v3 }
  0xba   : > { %v767_v21 = vpop.xlane.xlu1 %766  ;;  %v761_v22 = vpop.xlane.xlu0 %760 }
  0xbb   : > { %v780_v23 = vmul.f32 %v2446_v20, %v767_v21  ;;  %v778_v24 = vmul.f32 %v2446_v20, %v761_v22  ;;  %v2092_v21 = vld [vmem:[%s2885_s24] ss:$0 sm:$0xff] }
  0xbd   : > { %v2450_v25 = vsub.f32 %v754_v6, %v780_v23  ;;  %v2452_v26 = vsub.f32 %v752_v7, %v778_v24  ;;  %v959_v6 = vld [vmem:[%s2854_s11] sm:$0xff] }
  0xbe   : > { %v1008_v7 = vld [vmem:[%s2855_s12] sm:$0xff]  ;;  %990 = vmatpush.msrb.mxu1 %v959_v6 }
  0xbf   : > { %v788_v27 = vmul.f32 %v2450_v25, %v2450_v25  ;;  %v786_v28 = vmul.f32 %v2452_v26, %v2452_v26  ;;  %1039 = vmatpush.msrb.mxu2 %v1008_v7 }
  0xc1   : > { %v796_v29 = vsel %vm758_vm1, %v788_v27, 0.0  ;;  %v790_v30 = vsel %vm758_vm1, %v786_v28, 0.0 }
  0xc2   : > { %v770_v31 = vpop.xlane.xlu1 %769  ;;  %797 = vadd.xlane.f32.xlu0 %v796_v29  ;;  %791 = vadd.xlane.f32.xlu2 %v790_v30  ;;  %v764_v32 = vpop.xlane.xlu0 %763 }
  0xc3   : > { %v781_v33 = vmul.f32 %v2446_v20, %v770_v31  ;;  %v779_v34 = vmul.f32 %v2446_v20, %v764_v32  ;;  %v868_v31 = vld [vmem:[#allocation9] sm:$0xff] }
  0xc5   : > { %v2462_v35 = vsub.f32 %v755_v10, %v781_v33  ;;  %v2464_v36 = vsub.f32 %v753_v11, %v779_v34 }
  0xc7   : > { %v789_v37 = vmul.f32 %v2462_v35, %v2462_v35  ;;  %v787_v38 = vmul.f32 %v2464_v36, %v2464_v36 }
  0xc9   : > { %v799_v39 = vsel %vm758_vm1, %v789_v37, 0.0  ;;  %v793_v40 = vsel %vm758_vm1, %v787_v38, 0.0  ;;  %v2093_v37 = vld [vmem:[%s2848_s5] ss:$0 sm:$0xff] }
  0xca   : > { %800 = vadd.xlane.f32.xlu1 %v799_v39  ;;  %794 = vadd.xlane.f32.xlu2 %v793_v40 }
 0x135   : > { %v792_v43 = vpop.xlane.xlu2 %791  ;;  %v798_v44 = vpop.xlane.xlu0 %797 }
 0x136   : > { %v802_v46 = vmul.f32 %v792_v43, %v2446_v20  ;;  %v804_v47 = vmul.f32 %v798_v44, %v2446_v20 }
 0x138   : > { %v806_v49 = vadd.f32 1e-05, %v802_v46  ;;  %v808_v50 = vadd.f32 1e-05, %v804_v47 }
 0x13a   : > { %2103 = vrsqrt.f32 %v806_v49  ;;  %vm816_vm4 = vweird.f32 %v806_v49  ;;  %vm836_vm5 = vweird.f32 %v808_v50 }
 0x13b   : > { %2105 = vrsqrt.f32 %v808_v50 }
 0x13d   : > { %v801_v51 = vpop.xlane.xlu1 %800  ;;  %v795_v52 = vpop.xlane.xlu2 %794 }
 0x13e   : > { %v805_v53 = vmul.f32 %v801_v51, %v2446_v20  ;;  %v803_v54 = vmul.f32 %v795_v52, %v2446_v20 }
 0x140   : > { %v2104_v55 = vpop.eup %2103  ;;  %v809_v56 = vadd.f32 1e-05, %v805_v53  ;;  %v2488_v57 = vadd.f32 1e-05, %v803_v54 }
 0x141   : > { %v2106_v58 = vpop.eup %2105  ;;  %v811_v59 = vmul.f32 %v2104_v55, %v806_v49  ;;  %vm817_vm3 = vweird.f32 %v2104_v55 }
 0x142   : > { %v831_v63 = vmul.f32 %v2106_v58, %v808_v50  ;;  %2107 = vrsqrt.f32 %v809_v56  ;;  %vm837_vm6 = vweird.f32 %v2106_v58  ;;  %vm818_vm7 = vmor %vm816_vm4, %vm817_vm3  ;;  %vm846_vm9 = vweird.f32 %v809_v56 }
 0x143   : > { %v812_v1 = vmul.f32 %v2104_v55, %v811_v59  ;;  %2109 = vrsqrt.f32 %v2488_v57  ;;  %vm838_vm8 = vmor %vm836_vm5, %vm837_vm6  ;;  %vm826_vm13 = vweird.f32 %v2488_v57  ;;  %v2095_v59 = vld [vmem:[%s2850_s7] ss:$0 sm:$0xff] }
 0x144   : > { %v832_v4 = vmul.f32 %v2106_v58, %v831_v63 }
 0x145   : > { %v813_v5 = vmul.f32 0.5, %v812_v1 }
 0x146   : > { %v833_v8 = vmul.f32 0.5, %v832_v4 }
 0x147   : > { %v814_v9 = vsub.f32 1.5, %v813_v5 }
 0x148   : > { %v2108_v10 = vpop.eup %2107  ;;  %v834_v11 = vsub.f32 1.5, %v833_v8 }
 0x149   : > { %v2110_v12 = vpop.eup %2109  ;;  %v815_v13 = vmul.f32 %v2104_v55, %v814_v9  ;;  %v841_v14 = vmul.f32 %v2108_v10, %v809_v56  ;;  %vm847_vm10 = vweird.f32 %v2108_v10 }
 0x14a   : > { %v835_v16 = vmul.f32 %v2106_v58, %v834_v11  ;;  %v821_v17 = vmul.f32 %v2110_v12, %v2488_v57  ;;  %vm827_vm11 = vweird.f32 %v2110_v12  ;;  %vm848_vm12 = vmor %vm846_vm9, %vm847_vm10 }
 0x14b   : > { %v819_v18 = vsel %vm818_vm7, %v2104_v55, %v815_v13  ;;  %v842_v19 = vmul.f32 %v2108_v10, %v841_v14  ;;  %vm828_vm14 = vmor %vm826_vm13, %vm827_vm11 }
 0x14c   : > { %v850_v22 = vmul.f32 %v819_v18, %v2452_v26  ;;  %v822_v23 = vmul.f32 %v2110_v12, %v821_v17  ;;  %v839_v24 = vsel %vm838_vm8, %v2106_v58, %v835_v16  ;;  %v1142_v18 = vld [vmem:[#allocation8] sm:$0xff] }
 0x14d   : > { %v843_v27 = vmul.f32 0.5, %v842_v19  ;;  %v852_v33 = vmul.f32 %v839_v24, %v2450_v25  ;;  %v2096_v19 = vld [vmem:[%s2852_s9] ss:$0 sm:$0xff] }
 0x14e   : > { %v857_v28 = vmul.f32 %v2091_v15, %v850_v22  ;;  %v823_v29 = vmul.f32 0.5, %v822_v23 }
 0x14f   : > { %v844_v30 = vsub.f32 1.5, %v843_v27  ;;  %v859_v41 = vmul.f32 %v2091_v15, %v852_v33 }
 0x150   : > { %v864_v32 = vadd.f32 %v2092_v21, %v857_v28  ;;  %v824_v34 = vsub.f32 1.5, %v823_v29 }
 0x151   : > { %v845_v26 = vmul.f32 %v2108_v10, %v844_v30  ;;  %v866_v48 = vadd.f32 %v2092_v21, %v859_v41 }
 0x152   : > { %v825_v38 = vmul.f32 %v2110_v12, %v824_v34  ;;  %v870_v39 = vsub.f32 %v864_v32, %v868_v31 }
 0x153   : > { %v849_v40 = vsel %vm848_vm12, %v2108_v10, %v845_v26 }
 0x154   : > { %v853_v42 = vmul.f32 %v849_v40, %v2462_v35  ;;  %v829_v43 = vsel %vm828_vm14, %v2110_v12, %v825_v38  ;;  %v878_v44 = vmul.f32 %v2093_v37, %v870_v39  ;;  %v902_v61 = vmul.f32 %v2095_v59, %v870_v39  ;;  %v1129_v12 = vld [vmem:[%s2851_s8] sm:$0x1] }
 0x155   : > { %v851_v25 = vmul.f32 %v829_v43, %v2464_v36  ;;  %v2094_v36 = vld [vmem:[%s2849_s6] ss:$0 sm:$0xff]  ;;  %v1130_v13 = vmul.f32 1.442695, %v1129_v12 }
 0x156   : > { %v860_v45 = vmul.f32 %v2091_v15, %v853_v42  ;;  %v882_v46 = vadd.f32 %v878_v44, %v868_v31  ;;  %v890_v60 = vmul.f32 %v2094_v36, %v870_v39  ;;  %v906_v63 = vadd.f32 %v902_v61, %v868_v31 }
 0x157   : > { %v858_v47 = vmul.f32 %v2091_v15, %v851_v25  ;;  %2111 = vpow2.f32 %v1130_v13  ;;  %v1141_v25 = vld [vmem:[#allocation7] sm:$0xff] }
 0x158   : > { %1952 = vmatmul.msk.f32.vlgmr.msra.gmra.mxu0 %vm758_vm1, %v882_v46  ;;  %v867_v49 = vadd.f32 %v2092_v21, %v860_v45  ;;  %v894_v62 = vadd.f32 %v890_v60, %v868_v31 }
 0x159   : > { %v865_v50 = vadd.f32 %v2092_v21, %v858_v47 }
 0x15a   : > { %869 = vst.msk [vmem:[#allocation9] sm:$0xff] %vm758_vm1, %v867_v49  ;;  %v873_v51 = vsub.f32 %v867_v49, %v866_v48 }
 0x15b   : > { %v871_v52 = vsub.f32 %v865_v50, %v864_v32  ;;  %v872_v53 = vsub.f32 %v866_v48, %v865_v50 }
 0x15c   : > { %v881_v54 = vmul.f32 %v2093_v37, %v873_v51  ;;  %v893_v8 = vmul.f32 %v2094_v36, %v873_v51  ;;  %v905_v9 = vmul.f32 %v2095_v59, %v873_v51 }
 0x15d   : > { %v879_v55 = vmul.f32 %v2093_v37, %v871_v52  ;;  %v880_v35 = vmul.f32 %v2093_v37, %v872_v53  ;;  %v891_v0 = vmul.f32 %v2094_v36, %v871_v52  ;;  %v903_v1 = vmul.f32 %v2095_v59, %v871_v52  ;;  %v2112_v14 = vpop.eup %2111 }
 0x15e   : > { %v885_v56 = vadd.f32 %v881_v54, %v866_v48  ;;  %v892_v4 = vmul.f32 %v2094_v36, %v872_v53  ;;  %v904_v5 = vmul.f32 %v2095_v59, %v872_v53  ;;  %v897_v10 = vadd.f32 %v893_v8, %v866_v48 }
 0x15f   : > { %v883_v57 = vadd.f32 %v879_v55, %v864_v32  ;;  %v884_v58 = vadd.f32 %v880_v35, %v865_v50  ;;  %v895_v2 = vadd.f32 %v891_v0, %v864_v32  ;;  %v907_v3 = vadd.f32 %v903_v1, %v864_v32 }
 0x160   : > { %1955 = vmatmul.msk.f32.vlgmr.msra.gmra.mxu3 %vm758_vm1, %v885_v56  ;;  %v896_v6 = vadd.f32 %v892_v4, %v865_v50  ;;  %v908_v7 = vadd.f32 %v904_v5, %v865_v50  ;;  %v909_v11 = vadd.f32 %v905_v9, %v866_v48  ;;  %v1132_v15 = vsub.f32 0.0, %v2112_v14  ;;  %v1140_v48 = vld [vmem:[#allocation6] sm:$0xff] }
 0x161   : > { %1953 = vmatmul.msk.f32.vlgmr.msra.gmra.mxu1 %vm758_vm1, %v883_v57  ;;  %1954 = vmatmul.msk.f32.vlgmr.msra.gmra.mxu2 %vm758_vm1, %v884_v58 }
 0x162   : > { %v2553_v17 = vperm.slane %v1132_v15, 0 }
 0x164   : > { %v1160_v21 = vadd.f32 %v1142_v18, %v2553_v17 }
 0x169   : > { %1956 = vmatmul.msk.f32.vlgmr.msrb.gmra.mxu1 %vm758_vm1, %v894_v62  ;;  %1960 = vmatmul.msk.f32.vlgmr.msrb.gmra.mxu2 %vm758_vm1, %v906_v63 }
 0x171   : > { %1957 = vmatmul.msk.f32.gmra.mxu1 %vm758_vm1, %v895_v2  ;;  %1961 = vmatmul.msk.f32.gmra.mxu2 %vm758_vm1, %v907_v3 }
 0x179   : > { %1958 = vmatmul.msk.f32.gmra.mxu1 %vm758_vm1, %v896_v6  ;;  %1962 = vmatmul.msk.f32.gmra.mxu2 %vm758_vm1, %v908_v7 }
 0x181   : > { %1959 = vmatmul.msk.f32.gmra.mxu1 %vm758_vm1, %v897_v10  ;;  %1963 = vmatmul.msk.f32.gmra.mxu2 %vm758_vm1, %v909_v11 }
 0x1d5   : > { %v943_v16 = vpop.f32.mrf.mxu0 }
 0x1d6   : > { %955 = vst.msk [vmem:[#allocation2] sm:$0xff] %vm758_vm1, %v943_v16 }
 0x1dd   : > { %v1143_v22 = vld [vmem:[#allocation2] sm:$0xff] }
 0x1de   : > { %v1145_v23 = vadd.f32 %v2096_v19, %v1143_v22  ;;  %v1161_v24 = vmax.f32 %v1160_v21, %v1143_v22  ;;  %v946_v27 = vpop.f32.mrf.mxu1 }
 0x1df   : > { %956 = vst.msk [vmem:[#allocation2 + $0x8] sm:$0xff] %vm758_vm1, %v946_v27 }
 0x1e0   : > { %v1146_v28 = vmax.f32 %v1142_v18, %v1145_v23  ;;  %v1162_v29 = vsub.f32 %v1160_v21, %v1161_v24  ;;  %v1165_v30 = vsub.f32 %v1143_v22, %v1161_v24  ;;  %v1194_v40 = vadd.f32 %v1161_v24, %v2553_v17 }
 0x1e2   : > { %v1147_v31 = vsub.f32 %v1142_v18, %v1146_v28  ;;  %v1150_v32 = vsub.f32 %v1145_v23, %v1146_v28  ;;  %v1163_v33 = vmul.f32 1.442695, %v1162_v29  ;;  %v1166_v34 = vmul.f32 1.442695, %v1165_v30 }
 0x1e3   : > { %v952_v37 = vpop.f32.mrf.mxu3 }
 0x1e4   : > { %v1148_v26 = vmul.f32 1.442695, %v1147_v31  ;;  %v1151_v38 = vmul.f32 1.442695, %v1150_v32  ;;  %2113 = vpow2.f32 %v1163_v33  ;;  %v949_v39 = vpop.f32.mrf.mxu2  ;;  %958 = vst.msk [vmem:[#allocation2 + $0x18] sm:$0xff] %vm758_vm1, %v952_v37 }
 0x1e5   : > { %2115 = vpow2.f32 %v1166_v34  ;;  %957 = vst.msk [vmem:[#allocation2 + $0x10] sm:$0xff] %vm758_vm1, %v949_v39 }
 0x1e6   : > { %2117 = vpow2.f32 %v1148_v26  ;;  %v1174_v41 = vld [vmem:[#allocation2 + $0x8] sm:$0xff]  ;;  %v992_v42 = vpop.f32.mrf.mxu1  ;;  %v1353_v26 = vld [vmem:[%s2856_s13 + $0x18] sm:$0xff] }
 0x1e7   : > { %2119 = vpow2.f32 %v1151_v38  ;;  %v1177_v43 = vadd.f32 %v2096_v19, %v1174_v41  ;;  %v1195_v44 = vmax.f32 %v1194_v40, %v1174_v41  ;;  %1004 = vst.msk [vmem:[#allocation3] sm:$0xff] %vm758_vm1, %v992_v42  ;;  %1378 = vmatpush.msrb.mxu3 %v1353_v26 }
 0x1e9   : > { %v1178_v45 = vmax.f32 %v1161_v24, %v1177_v43  ;;  %v1196_v46 = vsub.f32 %v1194_v40, %v1195_v44  ;;  %v1199_v47 = vsub.f32 %v1174_v41, %v1195_v44  ;;  %v1228_v58 = vadd.f32 %v1195_v44, %v2553_v17 }
 0x1ea   : > { %v2114_v49 = vpop.eup %2113 }
 0x1eb   : > { %v2116_v50 = vpop.eup %2115  ;;  %v1171_v51 = vmul.f32 %v2114_v49, %v1141_v25  ;;  %v1179_v52 = vsub.f32 %v1161_v24, %v1178_v45  ;;  %v1182_v53 = vsub.f32 %v1177_v43, %v1178_v45  ;;  %v1197_v54 = vmul.f32 1.442695, %v1196_v46  ;;  %v2564_v55 = vld [vmem:[#allocation2 + $0x18] sm:$0xff] }
 0x1ec   : > { %v2118_v35 = vpop.eup %2117  ;;  %v1200_v56 = vmul.f32 1.442695, %v1199_v47  ;;  %v1208_v57 = vld [vmem:[#allocation2 + $0x10] sm:$0xff]  ;;  %v1245_v36 = vadd.f32 %v2096_v19, %v2564_v55  ;;  %v1168_v59 = vmul.f32 %v2114_v49, %v1140_v48  ;;  %v1041_v60 = vpop.f32.mrf.mxu2 }
 0x1ed   : > { %v2120_v61 = vpop.eup %2119  ;;  %v1157_v62 = vmul.f32 %v2118_v35, %v1141_v25  ;;  %v1172_v63 = vadd.f32 %v2116_v50, %v1171_v51  ;;  %v1180_v0 = vmul.f32 1.442695, %v1179_v52  ;;  %v1183_v1 = vmul.f32 1.442695, %v1182_v53  ;;  %v1351_v51 = vld [vmem:[%s2856_s13 + $0x8] sm:$0xff] }
 0x1ee   : > { %2121 = vpow2.f32 %v1197_v54  ;;  %v1211_v2 = vadd.f32 %v2096_v19, %v1208_v57  ;;  %v1229_v3 = vmax.f32 %v1228_v58, %v1208_v57  ;;  %v1144_v4 = vld [vmem:[#allocation3] sm:$0xff]  ;;  %v1153_v5 = vmul.f32 %v2118_v35, %v1140_v48  ;;  %v995_v6 = vpop.f32.mrf.mxu1 }
 0x1ef   : > { %v1158_v7 = vadd.f32 %v2120_v61, %v1157_v62  ;;  %2123 = vpow2.f32 %v1180_v0  ;;  %v1154_v8 = vmul.f32 %v2120_v61, %v1144_v4  ;;  %v1169_v9 = vmul.f32 %v2116_v50, %v1144_v4  ;;  %1005 = vst.msk [vmem:[#allocation3 + $0x8] sm:$0xff] %vm758_vm1, %v995_v6 }
 0x1f0   : > { %2125 = vpow2.f32 %v1183_v1  ;;  %v1212_v10 = vmax.f32 %v1195_v44, %v1211_v2  ;;  %v1230_v11 = vsub.f32 %v1228_v58, %v1229_v3  ;;  %v1233_v12 = vsub.f32 %v1208_v57, %v1229_v3 }
 0x1f1   : > { %1159 = vst.msk [vmem:[#allocation5] sm:$0xff] %vm758_vm1, %v1158_v7  ;;  %2127 = vpow2.f32 %v1200_v56  ;;  %v1246_v13 = vmax.f32 %v1229_v3, %v1245_v36  ;;  %v1262_v14 = vadd.f32 %v1229_v3, %v2553_v17  ;;  %v1155_v15 = vadd.f32 %v1154_v8, %v1153_v5 }
 0x1f2   : > { %v1213_v16 = vsub.f32 %v1195_v44, %v1212_v10  ;;  %v1216_v18 = vsub.f32 %v1211_v2, %v1212_v10  ;;  %v1231_v19 = vmul.f32 1.442695, %v1230_v11  ;;  %v1234_v21 = vmul.f32 1.442695, %v1233_v12  ;;  %v1352_v44 = vld [vmem:[%s2856_s13 + $0x10] sm:$0xff] }
 0x1f3   : > { %v1247_v22 = vsub.f32 %v1229_v3, %v1246_v13  ;;  %v1250_v23 = vsub.f32 %v1245_v36, %v1246_v13  ;;  %v1263_v24 = vmax.f32 %v1262_v14, %v2564_v55  ;;  %1156 = vst.msk [vmem:[#allocation4] sm:$0xff] %vm758_vm1, %v1155_v15  ;;  %v1170_v27 = vadd.f32 %v1169_v9, %v1168_v59 }
 0x1f4   : > { %v2122_v28 = vpop.eup %2121  ;;  %v1214_v29 = vmul.f32 1.442695, %v1213_v16  ;;  %v1217_v30 = vmul.f32 1.442695, %v1216_v18  ;;  %2129 = vpow2.f32 %v1231_v19  ;;  %v1964_v31 = vmul.f32 -1.442695, %v1041_v60  ;;  %v1044_v32 = vpop.f32.mrf.mxu2  ;;  %1379 = vmatpush.msrb.mxu3 %v1352_v44 }
 0x1f5   : > { %v2124_v33 = vpop.eup %2123  ;;  %v1205_v17 = vmul.f32 %v2122_v28, %v1172_v63  ;;  %2131 = vpow2.f32 %v1234_v21  ;;  %v1248_v34 = vmul.f32 1.442695, %v1247_v22  ;;  %v1251_v37 = vmul.f32 1.442695, %v1250_v23  ;;  %1277 = vst.msk [vmem:[#allocation8] sm:$0xff] %vm758_vm1, %v1263_v24 }
 0x1f6   : > { %v2126_v38 = vpop.eup %2125  ;;  %v1190_v39 = vmul.f32 %v2124_v33, %v1172_v63  ;;  %2133 = vpow2.f32 %v1214_v29  ;;  %v1264_v40 = vsub.f32 %v1262_v14, %v1263_v24  ;;  %v1267_v41 = vsub.f32 %v2564_v55, %v1263_v24  ;;  %v1176_v42 = vld [vmem:[#allocation3 + $0x8] sm:$0xff]  ;;  %v998_v43 = vpop.f32.mrf.mxu1  ;;  %v1350_v55 = vld [vmem:[%s2856_s13] sm:$0xff]  ;;  %1380 = vmatpush.msrb.mxu3 %v1351_v51 }
 0x1f7   : > { %v2128_v25 = vpop.eup %2127  ;;  %2135 = vpow2.f32 %v1217_v30  ;;  %v1185_v45 = vmul.f32 %v2124_v33, %v1170_v27  ;;  %v1186_v46 = vmul.f32 %v2126_v38, %v1176_v42  ;;  %v1202_v47 = vmul.f32 %v2122_v28, %v1170_v27  ;;  %1006 = vst.msk [vmem:[#allocation3 + $0x10] sm:$0xff] %vm758_vm1, %v998_v43 }
 0x1f8   : > { %v1191_v48 = vadd.f32 %v2126_v38, %v1190_v39  ;;  %v1206_v49 = vadd.f32 %v2128_v25, %v1205_v17  ;;  %2137 = vpow2.f32 %v1248_v34  ;;  %v1265_v50 = vmul.f32 1.442695, %v1264_v40  ;;  %v2590_v59 = vld [vmem:[#allocation5] sm:$0xff]  ;;  %1381 = vmatpush.msrb.mxu3 %v1350_v55 }
 0x1f9   : > { %2139 = vpow2.f32 %v1251_v37  ;;  %v1268_v52 = vmul.f32 1.442695, %v1267_v41  ;;  %v1187_v53 = vadd.f32 %v1186_v46, %v1185_v45  ;;  %v1203_v54 = vmul.f32 %v2128_v25, %v1176_v42 }
 0x1fa   : > { %v2130_v35 = vpop.eup %2129  ;;  %1193 = vst.msk [vmem:[#allocation5 + $0x8] sm:$0xff] %vm758_vm1, %v1191_v48  ;;  %2141 = vpow2.f32 %v1265_v50  ;;  %v1965_v56 = vmul.f32 -1.442695, %v1044_v32  ;;  %v1297_v42 = vand.u32 2147483648, %v2590_v59  ;;  %vm1291_vm0 = vweird.f32 %v2590_v59 }
 0x1fb   : > { %v2132_v57 = vpop.eup %2131  ;;  %v1239_v58 = vmul.f32 %v2130_v35, %v1206_v49  ;;  %2143 = vpow2.f32 %v1268_v52  ;;  %1189 = vst.msk [vmem:[#allocation4 + $0x8] sm:$0xff] %vm758_vm1, %v1187_v53  ;;  %v1204_v36 = vadd.f32 %v1203_v54, %v1202_v47 }
 0x1fc   : > { %v2134_v60 = vpop.eup %2133  ;;  %2145 = vpow2.f32 %v1964_v31  ;;  %v1047_v61 = vpop.f32.mrf.mxu2  ;;  %v1295_v31 = vand.u32 2147483647, %v2590_v59  ;;  %v1298_v51 = vor.u32 1.1754944e-38, %v1297_v42 }
 0x1fd   : > { %v2136_v62 = vpop.eup %2135  ;;  %v1224_v63 = vmul.f32 %v2134_v60, %v1206_v49  ;;  %v1240_v0 = vadd.f32 %v2132_v57, %v1239_v58  ;;  %2147 = vpow2.f32 %v1965_v56  ;;  %v1219_v3 = vmul.f32 %v2134_v60, %v1204_v36 }
 0x1fe   : > { %v2138_v1 = vpop.eup %2137  ;;  %v1210_v2 = vld [vmem:[#allocation3 + $0x10] sm:$0xff]  ;;  %v1966_v4 = vmul.f32 -1.442695, %v1047_v61  ;;  %v1001_v5 = vpop.f32.mrf.mxu1  ;;  %2149 = vrcp.f32 %v2590_v59  ;;  %v1236_v12 = vmul.f32 %v2130_v35, %v1204_v36  ;;  %vm2619_vm2 = vcmp.eq.f32.partialorder %v1295_v31, 8.507059e+37 }
 0x1ff   : > { %v2140_v6 = vpop.eup %2139  ;;  %v1225_v7 = vadd.f32 %v2136_v62, %v1224_v63  ;;  %v1258_v8 = vmul.f32 %v2138_v1, %v1240_v0  ;;  %v1220_v9 = vmul.f32 %v2136_v62, %v1210_v2  ;;  %v1237_v10 = vmul.f32 %v2132_v57, %v1210_v2  ;;  %1007 = vst.msk [vmem:[#allocation3 + $0x18] sm:$0xff] %vm758_vm1, %v1001_v5  ;;  %v1278_v2 = vld [vmem:[#allocation4] sm:$0xff] }
 0x200   : > { %v2142_v11 = vpop.eup %2141  ;;  %2151 = vpow2.f32 %v1966_v4 }
 0x201   : > { %v2144_v13 = vpop.eup %2143  ;;  %1227 = vst.msk [vmem:[#allocation5 + $0x10] sm:$0xff] %vm758_vm1, %v1225_v7  ;;  %v1259_v14 = vadd.f32 %v2140_v6, %v1258_v8  ;;  %v1273_v15 = vmul.f32 %v2142_v11, %v1240_v0  ;;  %v1221_v16 = vadd.f32 %v1220_v9, %v1219_v3  ;;  %v2595_v18 = vld [vmem:[#allocation5 + $0x8] sm:$0xff]  ;;  %v1238_v21 = vadd.f32 %v1237_v10, %v1236_v12 }
 0x202   : > { %v2146_v19 = vpop.eup %2145  ;;  %2153 = vrcp.f32 %v2595_v18  ;;  %v1309_v52 = vand.u32 2147483647, %v2595_v18  ;;  %v1311_v57 = vand.u32 2147483648, %v2595_v18  ;;  %vm1305_vm6 = vweird.f32 %v2595_v18 }
 0x203   : > { %v2148_v22 = vpop.eup %2147  ;;  %1261 = vst.msk [vmem:[#allocation5 + $0x18] sm:$0xff] %vm758_vm1, %v1259_v14  ;;  %v1274_v23 = vadd.f32 %v2144_v13, %v1273_v15  ;;  %v2599_v24 = vadd.f32 1.0, %v2146_v19  ;;  %v1253_v17 = vmul.f32 %v2138_v1, %v1238_v21  ;;  %v1270_v34 = vmul.f32 %v2142_v11, %v1238_v21 }
 0x204   : > { %v2150_v27 = vpop.eup %2149  ;;  %v2601_v28 = vadd.f32 1.0, %v2148_v22  ;;  %1223 = vst.msk [vmem:[#allocation4 + $0x10] sm:$0xff] %vm758_vm1, %v1221_v16  ;;  %v1050_v29 = vpop.f32.mrf.mxu2  ;;  %vm1310_vm10 = vcmp.eq.f32.partialorder %v1309_v52, 8.507059e+37  ;;  %v1312_v10 = vor.u32 1.1754944e-38, %v1311_v57 }
 0x205   : > { %1276 = vst.msk [vmem:[#allocation7] sm:$0xff] %vm758_vm1, %v1274_v23  ;;  %2155 = vrcp.f32 %v2599_v24  ;;  %v1967_v30 = vmul.f32 -1.442695, %v1050_v29  ;;  %v1287_v37 = vmul.f32 %v2150_v27, %v2590_v59  ;;  %vm1292_vm15 = vweird.f32 %v2150_v27  ;;  %v1279_v29 = vld [vmem:[#allocation4 + $0x8] sm:$0xff] }
 0x206   : > { %v2152_v32 = vpop.eup %2151  ;;  %2157 = vrcp.f32 %v2601_v28  ;;  %v1244_v33 = vld [vmem:[#allocation3 + $0x18] sm:$0xff]  ;;  %v1080_v35 = vand.u32 2147483648, %v2599_v24  ;;  %vm1293_vm3 = vmor %vm1291_vm0, %vm1292_vm15  ;;  %v1078_v1 = vand.u32 2147483647, %v2599_v24  ;;  %vm1074_vm7 = vweird.f32 %v2599_v24 }
 0x207   : > { %v2609_v26 = vadd.f32 1.0, %v2152_v32  ;;  %v1254_v38 = vmul.f32 %v2140_v6, %v1244_v33  ;;  %v1271_v39 = vmul.f32 %v2144_v13, %v1244_v33  ;;  %2159 = vpow2.f32 %v1967_v30 }
 0x208   : > { %v2611_v40 = vpop.eup %2153  ;;  %v1288_v41 = vsub.f32 1.0, %v1287_v37  ;;  %v2628_v53 = vld [vmem:[#allocation5 + $0x10] sm:$0xff]  ;;  %v1081_v8 = vor.u32 1.1754944e-38, %v1080_v35  ;;  %vm1079_vm11 = vcmp.eq.f32.partialorder %v1078_v1, 8.507059e+37  ;;  %v1093_v15 = vand.u32 2147483647, %v2601_v28 }
 0x209   : > { %2161 = vrcp.f32 %v2609_v26  ;;  %v1255_v43 = vadd.f32 %v1254_v38, %v1253_v17  ;;  %v1272_v44 = vadd.f32 %v1271_v39, %v1270_v34  ;;  %v1301_v45 = vmul.f32 %v2611_v40, %v2595_v18 }
 0x20a   : > { %v1289_v25 = vmul.f32 %v2150_v27, %v1288_v41  ;;  %vm1306_vm4 = vweird.f32 %v2611_v40  ;;  %2163 = vrcp.f32 %v2628_v53  ;;  %v1095_v16 = vand.u32 2147483648, %v2601_v28 }
 0x20b   : > { %v2156_v46 = vpop.eup %2155  ;;  %1257 = vst.msk [vmem:[#allocation4 + $0x18] sm:$0xff] %vm758_vm1, %v1255_v43  ;;  %v1302_v56 = vsub.f32 1.0, %v1301_v45  ;;  %vm1307_vm8 = vmor %vm1305_vm6, %vm1306_vm4  ;;  %vm1089_vm13 = vweird.f32 %v2601_v28  ;;  %vm1094_vm15 = vcmp.eq.f32.partialorder %v1093_v15, 8.507059e+37  ;;  %v1325_v17 = vand.u32 2147483648, %v2628_v53 }
 0x20c   : > { %v2623_v48 = vpop.eup %2157  ;;  %v1070_v49 = vmul.f32 %v2156_v46, %v2599_v24  ;;  %1275 = vst.msk [vmem:[#allocation6] sm:$0xff] %vm758_vm1, %v1272_v44  ;;  %v1290_v50 = vadd.f32 %v2150_v27, %v1289_v25  ;;  %vm1075_vm5 = vweird.f32 %v2156_v46  ;;  %v1285_v24 = vld [vmem:[#allocation5 + $0x18] sm:$0xff]  ;;  %v1096_v33 = vor.u32 1.1754944e-38, %v1095_v16  ;;  %v2195_v16 = vld [vmem:[%s2422_s16 + $0x10] sm:$0xff] }
 0x20d   : > { %v2160_v54 = vpop.eup %2159  ;;  %v1085_v55 = vmul.f32 %v2623_v48, %v2601_v28  ;;  %v1303_v63 = vmul.f32 %v2611_v40, %v1302_v56  ;;  %vm1076_vm9 = vmor %vm1074_vm7, %vm1075_vm5  ;;  %vm1090_vm12 = vweird.f32 %v2623_v48  ;;  %v1323_v38 = vand.u32 2147483647, %v2628_v53 }
 0x20e   : > { %v1071_v58 = vsub.f32 1.0, %v1070_v49  ;;  %v2635_v36 = vadd.f32 1.0, %v2160_v54  ;;  %v1294_v59 = vsel %vm1293_vm3, %v2150_v27, %v1290_v50  ;;  %vm2663_vm14 = vmor %vm1089_vm13, %vm1090_vm12  ;;  %v1326_v43 = vor.u32 1.1754944e-38, %v1325_v17 }
 0x20f   : > { %v2638_v60 = vpop.eup %2161  ;;  %v1299_v61 = vsel %vm2619_vm2, %v1298_v51, %v1294_v59  ;;  %v1086_v62 = vsub.f32 1.0, %v1085_v55  ;;  %v1304_v4 = vadd.f32 %v2611_v40, %v1303_v63  ;;  %vm1319_vm2 = vweird.f32 %v2628_v53  ;;  %v1280_v51 = vld [vmem:[#allocation4 + $0x10] sm:$0xff] }
 0x210   : > { %2165 = vrcp.f32 %v2635_v36  ;;  %v1072_v0 = vmul.f32 %v2156_v46, %v1071_v58  ;;  %v1100_v5 = vmul.f32 %v2638_v60, %v2609_v26  ;;  %v1342_v7 = vmul.f32 %v1299_v61, %v1278_v2  ;;  %v2164_v13 = vpop.eup %2163 }
 0x211   : > { %v1087_v3 = vmul.f32 %v2623_v48, %v1086_v62  ;;  %v1308_v9 = vsel %vm1307_vm8, %v2611_v40, %v1304_v4  ;;  %v1315_v23 = vmul.f32 %v2164_v13, %v2628_v53  ;;  %2167 = vrcp.f32 %v1285_v24 }
 0x212   : > { %v1073_v6 = vadd.f32 %v2156_v46, %v1072_v0  ;;  %v1313_v18 = vsel %vm1310_vm10, %v1312_v10, %v1308_v9  ;;  %v1101_v22 = vsub.f32 1.0, %v1100_v5  ;;  %vm1320_vm0 = vweird.f32 %v2164_v13  ;;  %v1281_v5 = vld [vmem:[#allocation4 + $0x18] sm:$0xff] }
 0x213   : > { %v1088_v12 = vadd.f32 %v2623_v48, %v1087_v3  ;;  %v1343_v32 = vmul.f32 %v1313_v18, %v1279_v29  ;;  %v1316_v28 = vsub.f32 1.0, %v1315_v23  ;;  %vm1321_vm3 = vmor %vm1319_vm2, %vm1320_vm0  ;;  %vm1105_vm4 = vweird.f32 %v2638_v60 }
 0x214   : > { %v1077_v11 = vsel %vm1076_vm9, %v2156_v46, %v1073_v6  ;;  %v1102_v34 = vmul.f32 %v2638_v60, %v1101_v22  ;;  %vm1324_vm5 = vcmp.eq.f32.partialorder %v1323_v38, 8.507059e+37  ;;  %v1108_v46 = vand.u32 2147483647, %v2609_v26  ;;  %v2196_v22 = vld [vmem:[%s2422_s16 + $0x18] sm:$0xff] }
 0x215   : > { %v1082_v14 = vsel %vm1079_vm11, %v1081_v8, %v1077_v11  ;;  %v1092_v31 = vsel %vm2663_vm14, %v2623_v48, %v1088_v12  ;;  %v1317_v37 = vmul.f32 %v2164_v13, %v1316_v28  ;;  %v1110_v47 = vand.u32 2147483648, %v2609_v26  ;;  %v2193_v8 = vld [vmem:[%s2422_s16] sm:$0xff]  ;;  %v2194_v12 = vld [vmem:[%s2422_s16 + $0x8] sm:$0xff] }
 0x216   : > { %v2659_v19 = vpop.eup %2165  ;;  %v1346_v21 = vmul.f32 %v1342_v7, %v1082_v14  ;;  %v1097_v39 = vsel %vm1094_vm15, %v1096_v33, %v1092_v31  ;;  %v1103_v44 = vadd.f32 %v2638_v60, %v1102_v34  ;;  %vm1104_vm6 = vweird.f32 %v2609_v26 }
 0x217   : > { %v1115_v30 = vmul.f32 %v2659_v19, %v2635_v36  ;;  %v1347_v41 = vmul.f32 %v1343_v32, %v1097_v39  ;;  %v1318_v42 = vadd.f32 %v2164_v13, %v1317_v37  ;;  %v2168_v45 = vpop.eup %2167  ;;  %vm1106_vm7 = vmor %vm1104_vm6, %vm1105_vm4  ;;  %vm1109_vm8 = vcmp.eq.f32.partialorder %v1108_v46, 8.507059e+37 }
 0x218   : > { %1968 = vmatmul.msk.f32.vlgmr.msrb.gmra.mxu3 %vm758_vm1, %v1346_v21  ;;  %v1329_v50 = vmul.f32 %v2168_v45, %v1285_v24  ;;  %v1107_v52 = vsel %vm1106_vm7, %v2638_v60, %v1103_v44  ;;  %v1111_v55 = vor.u32 1.1754944e-38, %v1110_v47  ;;  %vm1120_vm9 = vweird.f32 %v2659_v19 }
 0x219   : > { %v1116_v40 = vsub.f32 1.0, %v1115_v30  ;;  %v1322_v25 = vsel %vm1321_vm3, %v2164_v13, %v1318_v42  ;;  %v1339_v35 = vand.u32 2147483648, %v1285_v24  ;;  %vm1334_vm10 = vweird.f32 %v2168_v45 }
 0x21a   : > { %v1327_v48 = vsel %vm1324_vm5, %v1326_v43, %v1322_v25  ;;  %v1330_v54 = vsub.f32 1.0, %v1329_v50  ;;  %v1337_v58 = vand.u32 2147483647, %v1285_v24  ;;  %v1112_v26 = vsel %vm1109_vm8, %v1111_v55, %v1107_v52  ;;  %v1542_v52 = vld [vmem:[%s2860_s17 + $0x8] sm:$0xff] }
 0x21b   : > { %v1117_v49 = vmul.f32 %v2659_v19, %v1116_v40  ;;  %v1344_v53 = vmul.f32 %v1327_v48, %v1280_v51  ;;  %vm1119_vm11 = vweird.f32 %v2635_v36  ;;  %v1125_v59 = vand.u32 2147483648, %v2635_v36  ;;  %v1543_v51 = vld [vmem:[%s2860_s17 + $0x10] sm:$0xff] }
 0x21c   : > { %v1331_v57 = vmul.f32 %v2168_v45, %v1330_v54  ;;  %vm1121_vm12 = vmor %vm1119_vm11, %vm1120_vm9  ;;  %v1123_v60 = vand.u32 2147483647, %v2635_v36  ;;  %vm1333_vm13 = vweird.f32 %v1285_v24  ;;  %v1340_v63 = vor.u32 1.1754944e-38, %v1339_v35  ;;  %v1541_v54 = vld [vmem:[%s2860_s17] sm:$0xff] }
 0x21d   : > { %v1118_v56 = vadd.f32 %v2659_v19, %v1117_v49  ;;  %v1348_v61 = vmul.f32 %v1344_v53, %v1112_v26  ;;  %vm1335_vm14 = vmor %vm1333_vm13, %vm1334_vm10  ;;  %vm1338_vm15 = vcmp.eq.f32.partialorder %v1337_v58, 8.507059e+37  ;;  %v1126_v2 = vor.u32 1.1754944e-38, %v1125_v59  ;;  %v1544_v49 = vld [vmem:[%s2860_s17 + $0x18] sm:$0xff] }
 0x21e   : > { %v1332_v62 = vadd.f32 %v2168_v45, %v1331_v57  ;;  %vm1124_vm0 = vcmp.eq.f32.partialorder %v1123_v60, 8.507059e+37  ;;  %1569 = vmatpush.msrb.mxu0 %v1544_v49 }
 0x21f   : > { %v1122_v0 = vsel %vm1121_vm12, %v2659_v19, %v1118_v56 }
 0x220   : > { %1969 = vmatmul.msk.f32.gmra.mxu3 %vm758_vm1, %v1347_v41  ;;  %v1336_v1 = vsel %vm1335_vm14, %v2168_v45, %v1332_v62  ;;  %v1127_v4 = vsel %vm1124_vm0, %v1126_v2, %v1122_v0  ;;  %1570 = vmatpush.msrb.mxu0 %v1543_v51  ;;  %v2743_v2 = vld [vmem:[%s2890_s15] ss:$0 sm:$0xff] }
 0x221   : > { %v1341_v3 = vsel %vm1338_vm15, %v1340_v63, %v1336_v1 }
 0x222   : > { %v1345_v6 = vmul.f32 %v1341_v3, %v1281_v5  ;;  %1571 = vmatpush.msrb.mxu0 %v1542_v52  ;;  %v2748_v5 = vld [vmem:[%s2847_s4] ss:$0 sm:$0xff] }
 0x224   : > { %v1349_v36 = vmul.f32 %v1345_v6, %v1127_v4  ;;  %1572 = vmatpush.msrb.mxu0 %v1541_v54 }
 0x228   : > { %1970 = vmatmul.msk.f32.gmra.mxu3 %vm758_vm1, %v1348_v61 }
 0x230   : > { %1971 = vmatmul.msk.f32.gmra.mxu3 %vm758_vm1, %v1349_v36 }
 0x29b   : > { %v1383_v7 = vpop.f32.mrf.mxu3 }
 0x29c   : > { %v1395_v9 = vadd.f32 %v2193_v8, %v1383_v7 }
 0x29e   : > { %1399 = vst.msk [vmem:[#allocation11] sm:$0xff] %vm758_vm1, %v1395_v9  ;;  %v1405_v10 = vsel %vm758_vm1, %v1395_v9, 0.0 }
 0x29f   : > { %1406 = vadd.xlane.f32.xlu2 %v1405_v10 }
 0x2a3   : > { %v1386_v11 = vpop.f32.mrf.mxu3 }
 0x2a4   : > { %v1396_v13 = vadd.f32 %v2194_v12, %v1386_v11  ;;  %v1507_v11 = vld [vmem:[#allocation10] sm:$0xff] }
 0x2a6   : > { %1400 = vst.msk [vmem:[#allocation11 + $0x8] sm:$0xff] %vm758_vm1, %v1396_v13  ;;  %v1408_v14 = vsel %vm758_vm1, %v1396_v13, 0.0 }
 0x2a7   : > { %1409 = vadd.xlane.f32.xlu0 %v1408_v14 }
 0x2ab   : > { %v1389_v15 = vpop.f32.mrf.mxu3 }
 0x2ac   : > { %v1397_v18 = vadd.f32 %v2195_v16, %v1389_v15  ;;  %v2099_v15 = vld [vmem:[%s2891_s28] ss:$0 sm:$0xff] }
 0x2ad   : > { %v2100_v16 = vld [vmem:[%s2892_s0] ss:$0 sm:$0xff] }
 0x2ae   : > { %1401 = vst.msk [vmem:[#allocation11 + $0x10] sm:$0xff] %vm758_vm1, %v1397_v18  ;;  %v1411_v19 = vsel %vm758_vm1, %v1397_v18, 0.0 }
 0x2af   : > { %1412 = vadd.xlane.f32.xlu1 %v1411_v19 }
 0x2b3   : > { %v1392_v21 = vpop.f32.mrf.mxu3 }
 0x2b4   : > { %v1398_v23 = vadd.f32 %v2196_v22, %v1392_v21 }
 0x2b6   : > { %1402 = vst.msk [vmem:[#allocation11 + $0x18] sm:$0xff] %vm758_vm1, %v1398_v23  ;;  %v1414_v24 = vsel %vm758_vm1, %v1398_v23, 0.0 }
 0x2b7   : > { %1415 = vadd.xlane.f32.xlu2 %v1414_v24 }
 0x312   : > { %v1407_v27 = vpop.xlane.xlu2 %1406 }
 0x313   : > { %v1417_v29 = vmul.f32 %v1407_v27, %v2446_v20 }
 0x315   : > { %v1421_v30 = vsub.f32 %v1395_v9, %v1417_v29 }
 0x317   : > { %v1425_v31 = vmul.f32 %v1421_v30, %v1421_v30 }
 0x319   : > { %v1429_v32 = vsel %vm758_vm1, %v1425_v31, 0.0 }
 0x31a   : > { %1430 = vadd.xlane.f32.xlu0 %v1429_v32  ;;  %v1410_v28 = vpop.xlane.xlu0 %1409 }
 0x31b   : > { %v1418_v33 = vmul.f32 %v1410_v28, %v2446_v20 }
 0x31d   : > { %v2708_v17 = vsub.f32 %v1396_v13, %v1418_v33 }
 0x31f   : > { %v1426_v34 = vmul.f32 %v2708_v17, %v2708_v17 }
 0x321   : > { %v1432_v37 = vsel %vm758_vm1, %v1426_v34, 0.0 }
 0x322   : > { %1433 = vadd.xlane.f32.xlu1 %v1432_v37  ;;  %v1413_v38 = vpop.xlane.xlu1 %1412 }
 0x323   : > { %v1419_v39 = vmul.f32 %v1413_v38, %v2446_v20 }
 0x325   : > { %v2714_v40 = vsub.f32 %v1397_v18, %v1419_v39 }
 0x327   : > { %v1427_v41 = vmul.f32 %v2714_v40, %v2714_v40 }
 0x329   : > { %v1435_v42 = vsel %vm758_vm1, %v1427_v41, 0.0 }
 0x32a   : > { %1436 = vadd.xlane.f32.xlu2 %v1435_v42  ;;  %v1416_v43 = vpop.xlane.xlu2 %1415 }
 0x32b   : > { %v1420_v44 = vmul.f32 %v1416_v43, %v2446_v20 }
 0x32d   : > { %v2720_v25 = vsub.f32 %v1398_v23, %v1420_v44 }
 0x32f   : > { %v1428_v45 = vmul.f32 %v2720_v25, %v2720_v25 }
 0x331   : > { %v1438_v46 = vsel %vm758_vm1, %v1428_v45, 0.0 }
 0x332   : > { %1439 = vadd.xlane.f32.xlu0 %v1438_v46 }
 0x38d   : > { %v1431_v47 = vpop.xlane.xlu0 %1430 }
 0x38e   : > { %v1441_v48 = vmul.f32 %v1431_v47, %v2446_v20 }
 0x390   : > { %v1445_v50 = vadd.f32 1e-05, %v1441_v48 }
 0x392   : > { %2169 = vrsqrt.f32 %v1445_v50  ;;  %vm1455_vm3 = vweird.f32 %v1445_v50 }
 0x395   : > { %v1434_v53 = vpop.xlane.xlu1 %1433 }
 0x396   : > { %v1442_v55 = vmul.f32 %v1434_v53, %v2446_v20 }
 0x398   : > { %v2170_v35 = vpop.eup %2169  ;;  %v1446_v56 = vadd.f32 1e-05, %v1442_v55 }
 0x399   : > { %v1450_v57 = vmul.f32 %v2170_v35, %v1445_v50  ;;  %vm1456_vm2 = vweird.f32 %v2170_v35 }
 0x39a   : > { %2171 = vrsqrt.f32 %v1446_v56  ;;  %vm1457_vm4 = vmor %vm1455_vm3, %vm1456_vm2  ;;  %vm1465_vm6 = vweird.f32 %v1446_v56 }
 0x39b   : > { %v1451_v58 = vmul.f32 %v2170_v35, %v1450_v57 }
 0x39d   : > { %v1452_v26 = vmul.f32 0.5, %v1451_v58  ;;  %v1437_v59 = vpop.xlane.xlu2 %1436 }
 0x39e   : > { %v1443_v61 = vmul.f32 %v1437_v59, %v2446_v20 }
 0x39f   : > { %v1453_v60 = vsub.f32 1.5, %v1452_v26 }
 0x3a0   : > { %v2172_v62 = vpop.eup %2171  ;;  %v1447_v63 = vadd.f32 1e-05, %v1443_v61 }
 0x3a1   : > { %v1454_v0 = vmul.f32 %v2170_v35, %v1453_v60  ;;  %v1460_v1 = vmul.f32 %v2172_v62, %v1446_v56  ;;  %vm1466_vm5 = vweird.f32 %v2172_v62 }
 0x3a2   : > { %2173 = vrsqrt.f32 %v1447_v63  ;;  %vm1467_vm7 = vmor %vm1465_vm6, %vm1466_vm5  ;;  %vm1475_vm9 = vweird.f32 %v1447_v63 }
 0x3a3   : > { %v1458_v3 = vsel %vm1457_vm4, %v2170_v35, %v1454_v0  ;;  %v1461_v4 = vmul.f32 %v2172_v62, %v1460_v1 }
 0x3a4   : > { %v1489_v6 = vmul.f32 %v1458_v3, %v1421_v30 }
 0x3a5   : > { %v1462_v36 = vmul.f32 0.5, %v1461_v4  ;;  %v1440_v7 = vpop.xlane.xlu0 %1439 }
 0x3a6   : > { %v1496_v8 = vmul.f32 %v2743_v2, %v1489_v6  ;;  %v1444_v9 = vmul.f32 %v1440_v7, %v2446_v20 }
 0x3a7   : > { %v1463_v10 = vsub.f32 1.5, %v1462_v36 }
 0x3a8   : > { %v2174_v12 = vpop.eup %2173  ;;  %v1503_v13 = vadd.f32 %v2748_v5, %v1496_v8  ;;  %v1448_v14 = vadd.f32 1e-05, %v1444_v9 }
 0x3a9   : > { %v1464_v18 = vmul.f32 %v2172_v62, %v1463_v10  ;;  %v1470_v19 = vmul.f32 %v2174_v12, %v1447_v63  ;;  %vm1476_vm8 = vweird.f32 %v2174_v12 }
 0x3aa   : > { %2175 = vrsqrt.f32 %v1448_v14  ;;  %v1509_v20 = vsub.f32 %v1503_v13, %v1507_v11  ;;  %vm1477_vm10 = vmor %vm1475_vm9, %vm1476_vm8  ;;  %vm1485_vm12 = vweird.f32 %v1448_v14 }
 0x3ab   : > { %v1468_v21 = vsel %vm1467_vm7, %v2172_v62, %v1464_v18  ;;  %v1471_v22 = vmul.f32 %v2174_v12, %v1470_v19 }
 0x3ac   : > { %v1490_v23 = vmul.f32 %v1468_v21, %v2708_v17  ;;  %v1517_v24 = vmul.f32 %v2099_v15, %v1509_v20  ;;  %v1533_v27 = vmul.f32 %v2100_v16, %v1509_v20 }
 0x3ad   : > { %v1472_v29 = vmul.f32 0.5, %v1471_v22 }
 0x3ae   : > { %v1497_v30 = vmul.f32 %v2743_v2, %v1490_v23  ;;  %v1521_v31 = vadd.f32 %v1517_v24, %v1507_v11  ;;  %v1537_v32 = vadd.f32 %v1533_v27, %v1507_v11  ;;  %v2256_v11 = vmov 0.0  }
 0x3af   : > { %v1473_v28 = vsub.f32 1.5, %v1472_v29  ;;  %1666 = vst.msk [vmem:[#allocation14] sm:$0xff] %vm758_vm1, %v2256_v11 }
 0x3b0   : > { %v2176_v33 = vpop.eup %2175  ;;  %v1504_v34 = vadd.f32 %v2748_v5, %v1497_v30  ;;  %1525 = vst.msk [vmem:[#allocation12] sm:$0xff] %vm758_vm1, %v1521_v31  ;;  %1972 = vmatmul.msk.f32.vlgmr.msrb.gmra.mxu0 %vm758_vm1, %v1537_v32 }
 0x3b1   : > { %v1474_v37 = vmul.f32 %v2174_v12, %v1473_v28  ;;  %v1480_v38 = vmul.f32 %v2176_v33, %v1448_v14  ;;  %vm1486_vm11 = vweird.f32 %v2176_v33  ;;  %1667 = vst.msk [vmem:[#allocation14 + $0x8] sm:$0xff] %vm758_vm1, %v2256_v11 }
 0x3b2   : > { %v1510_v17 = vsub.f32 %v1504_v34, %v1503_v13  ;;  %vm1487_vm13 = vmor %vm1485_vm12, %vm1486_vm11  ;;  %1668 = vst.msk [vmem:[#allocation14 + $0x10] sm:$0xff] %vm758_vm1, %v2256_v11 }
 0x3b3   : > { %v1478_v39 = vsel %vm1477_vm10, %v2174_v12, %v1474_v37  ;;  %v1481_v41 = vmul.f32 %v2176_v33, %v1480_v38  ;;  %1669 = vst.msk [vmem:[#allocation14 + $0x18] sm:$0xff] %vm758_vm1, %v2256_v11 }
 0x3b4   : > { %v1491_v42 = vmul.f32 %v1478_v39, %v2714_v40  ;;  %v1518_v43 = vmul.f32 %v2099_v15, %v1510_v17  ;;  %v1534_v44 = vmul.f32 %v2100_v16, %v1510_v17 }
 0x3b5   : > { %v1482_v45 = vmul.f32 0.5, %v1481_v41 }
 0x3b6   : > { %v1498_v46 = vmul.f32 %v2743_v2, %v1491_v42  ;;  %v1522_v47 = vadd.f32 %v1518_v43, %v1503_v13  ;;  %v1538_v48 = vadd.f32 %v1534_v44, %v1503_v13 }
 0x3b7   : > { %v1483_v49 = vsub.f32 1.5, %v1482_v45 }
 0x3b8   : > { %v1505_v50 = vadd.f32 %v2748_v5, %v1498_v46  ;;  %1526 = vst.msk [vmem:[#allocation12 + $0x8] sm:$0xff] %vm758_vm1, %v1522_v47  ;;  %1973 = vmatmul.msk.f32.gmra.mxu0 %vm758_vm1, %v1538_v48 }
 0x3b9   : > { %v1484_v51 = vmul.f32 %v2176_v33, %v1483_v49 }
 0x3ba   : > { %v1511_v52 = vsub.f32 %v1505_v50, %v1504_v34 }
 0x3bb   : > { %v1488_v40 = vsel %vm1487_vm13, %v2176_v33, %v1484_v51 }
 0x3bc   : > { %v1492_v53 = vmul.f32 %v1488_v40, %v2720_v25  ;;  %v1519_v54 = vmul.f32 %v2099_v15, %v1511_v52  ;;  %v1535_v55 = vmul.f32 %v2100_v16, %v1511_v52 }
 0x3be   : > { %v1499_v35 = vmul.f32 %v2743_v2, %v1492_v53  ;;  %v1523_v56 = vadd.f32 %v1519_v54, %v1504_v34  ;;  %v1539_v57 = vadd.f32 %v1535_v55, %v1504_v34 }
 0x3c0   : > { %1527 = vst.msk [vmem:[#allocation12 + $0x10] sm:$0xff] %vm758_vm1, %v1523_v56  ;;  %1974 = vmatmul.msk.f32.gmra.mxu0 %vm758_vm1, %v1539_v57  ;;  %v1506_v58 = vadd.f32 %v2748_v5, %v1499_v35 }
 0x3c2   : > { %1508 = vst.msk [vmem:[#allocation10] sm:$0xff] %vm758_vm1, %v1506_v58  ;;  %v1512_v26 = vsub.f32 %v1506_v58, %v1505_v50 }
 0x3c4   : > { %v1520_v59 = vmul.f32 %v2099_v15, %v1512_v26  ;;  %v1536_v61 = vmul.f32 %v2100_v16, %v1512_v26 }
 0x3c6   : > { %v1524_v60 = vadd.f32 %v1520_v59, %v1505_v50  ;;  %v1540_v62 = vadd.f32 %v1536_v61, %v1505_v50 }
 0x3c8   : > { %1528 = vst.msk [vmem:[#allocation12 + $0x18] sm:$0xff] %vm758_vm1, %v1524_v60  ;;  %1975 = vmatmul.msk.f32.gmra.mxu0 %vm758_vm1, %v1540_v62 }
 0x42d   : > { %v1574_v25 = vpop.f32.mrf.mxu0 }
 0x42e   : > { %v1976_v63 = vmul.f32 -1.442695, %v1574_v25 }
 0x430   : > { %2177 = vpow2.f32 %v1976_v63 }
 0x435   : > { %v1577_v0 = vpop.f32.mrf.mxu0 }
 0x436   : > { %v2178_v1 = vpop.eup %2177  ;;  %v1977_v2 = vmul.f32 -1.442695, %v1577_v0 }
 0x437   : > { %v1598_v3 = vadd.f32 1.0, %v2178_v1 }
 0x438   : > { %2179 = vpow2.f32 %v1977_v2 }
 0x439   : > { %2181 = vrcp.f32 %v1598_v3  ;;  %v1613_v10 = vand.u32 2147483648, %v1598_v3  ;;  %v1611_v13 = vand.u32 2147483647, %v1598_v3  ;;  %vm1607_vm15 = vweird.f32 %v1598_v3 }
 0x43b   : > { %v1614_v20 = vor.u32 1.1754944e-38, %v1613_v10  ;;  %vm1612_vm2 = vcmp.eq.f32.partialorder %v1611_v13, 8.507059e+37 }
 0x43d   : > { %v1580_v4 = vpop.f32.mrf.mxu0 }
 0x43e   : > { %v2180_v5 = vpop.eup %2179  ;;  %v1978_v6 = vmul.f32 -1.442695, %v1580_v4 }
 0x43f   : > { %v2182_v36 = vpop.eup %2181  ;;  %v1599_v7 = vadd.f32 1.0, %v2180_v5 }
 0x440   : > { %v1603_v8 = vmul.f32 %v2182_v36, %v1598_v3  ;;  %2183 = vpow2.f32 %v1978_v6  ;;  %vm1608_vm14 = vweird.f32 %v2182_v36 }
 0x441   : > { %2185 = vrcp.f32 %v1599_v7  ;;  %vm1609_vm0 = vmor %vm1607_vm15, %vm1608_vm14  ;;  %v1628_v29 = vand.u32 2147483648, %v1599_v7  ;;  %v1626_v31 = vand.u32 2147483647, %v1599_v7  ;;  %vm1622_vm4 = vweird.f32 %v1599_v7 }
 0x442   : > { %v1604_v9 = vsub.f32 1.0, %v1603_v8 }
 0x443   : > { %v1629_v34 = vor.u32 1.1754944e-38, %v1628_v29  ;;  %vm1627_vm6 = vcmp.eq.f32.partialorder %v1626_v31, 8.507059e+37 }
 0x444   : > { %v1605_v12 = vmul.f32 %v2182_v36, %v1604_v9 }
 0x445   : > { %v1583_v14 = vpop.f32.mrf.mxu0 }
 0x446   : > { %v2184_v15 = vpop.eup %2183  ;;  %v1606_v16 = vadd.f32 %v2182_v36, %v1605_v12  ;;  %v1979_v18 = vmul.f32 -1.442695, %v1583_v14 }
 0x447   : > { %v2186_v19 = vpop.eup %2185  ;;  %v1600_v21 = vadd.f32 1.0, %v2184_v15 }
 0x448   : > { %v1610_v22 = vsel %vm1609_vm0, %v2182_v36, %v1606_v16  ;;  %v1618_v23 = vmul.f32 %v2186_v19, %v1599_v7  ;;  %2187 = vpow2.f32 %v1979_v18  ;;  %vm1623_vm3 = vweird.f32 %v2186_v19 }
 0x449   : > { %v1615_v24 = vsel %vm1612_vm2, %v1614_v20, %v1610_v22  ;;  %2189 = vrcp.f32 %v1600_v21  ;;  %vm1624_vm5 = vmor %vm1622_vm4, %vm1623_vm3  ;;  %v1643_v42 = vand.u32 2147483648, %v1600_v21  ;;  %v1641_v44 = vand.u32 2147483647, %v1600_v21 }
 0x44a   : > { %1662 = vst.msk [vmem:[#allocation13] sm:$0xff] %vm758_vm1, %v1615_v24  ;;  %v1619_v27 = vsub.f32 1.0, %v1618_v23  ;;  %vm1637_vm8 = vweird.f32 %v1600_v21 }
 0x44b   : > { %v1644_v47 = vor.u32 1.1754944e-38, %v1643_v42  ;;  %vm1642_vm10 = vcmp.eq.f32.partialorder %v1641_v44, 8.507059e+37 }
 0x44c   : > { %v1620_v30 = vmul.f32 %v2186_v19, %v1619_v27 }
 0x44e   : > { %v2188_v32 = vpop.eup %2187  ;;  %v1621_v28 = vadd.f32 %v2186_v19, %v1620_v30 }
 0x44f   : > { %v2190_v33 = vpop.eup %2189  ;;  %v1601_v37 = vadd.f32 1.0, %v2188_v32 }
 0x450   : > { %v1625_v38 = vsel %vm1624_vm5, %v2186_v19, %v1621_v28  ;;  %v1633_v17 = vmul.f32 %v2190_v33, %v1600_v21  ;;  %vm1638_vm7 = vweird.f32 %v2190_v33 }
 0x451   : > { %v1630_v39 = vsel %vm1627_vm6, %v1629_v34, %v1625_v38  ;;  %2191 = vrcp.f32 %v1601_v37  ;;  %vm1639_vm9 = vmor %vm1637_vm8, %vm1638_vm7  ;;  %v1658_v52 = vand.u32 2147483648, %v1601_v37  ;;  %v1656_v53 = vand.u32 2147483647, %v1601_v37 }
 0x452   : > { %1663 = vst.msk [vmem:[#allocation13 + $0x8] sm:$0xff] %vm758_vm1, %v1630_v39  ;;  %v1634_v41 = vsub.f32 1.0, %v1633_v17  ;;  %vm1652_vm12 = vweird.f32 %v1601_v37 }
 0x453   : > { %v1659_v55 = vor.u32 1.1754944e-38, %v1658_v52  ;;  %vm1657_vm14 = vcmp.eq.f32.partialorder %v1656_v53, 8.507059e+37 }
 0x454   : > { %v1635_v43 = vmul.f32 %v2190_v33, %v1634_v41 }
 0x456   : > { %v1636_v45 = vadd.f32 %v2190_v33, %v1635_v43 }
 0x457   : > { %v2192_v46 = vpop.eup %2191 }
 0x458   : > { %v1640_v48 = vsel %vm1639_vm9, %v2190_v33, %v1636_v45  ;;  %v1648_v49 = vmul.f32 %v2192_v46, %v1601_v37  ;;  %vm1653_vm11 = vweird.f32 %v2192_v46 }
 0x459   : > { %v1645_v50 = vsel %vm1642_vm10, %v1644_v47, %v1640_v48  ;;  %vm1654_vm13 = vmor %vm1652_vm12, %vm1653_vm11 }
 0x45a   : > { %1664 = vst.msk [vmem:[#allocation13 + $0x10] sm:$0xff] %vm758_vm1, %v1645_v50  ;;  %v1649_v51 = vsub.f32 1.0, %v1648_v49 }
 0x45c   : > { %v1650_v40 = vmul.f32 %v2192_v46, %v1649_v51 }
 0x45e   : > { %v1651_v54 = vadd.f32 %v2192_v46, %v1650_v40 }
 0x460   : > { %v1655_v35 = vsel %vm1654_vm13, %v2192_v46, %v1651_v54 }
 0x461   : > { %v1660_v56 = vsel %vm1657_vm14, %v1659_v55, %v1655_v35 }
 0x462   : > { %1665 = vst.msk [vmem:[#allocation13 + $0x18] sm:$0xff] %vm758_vm1, %v1660_v56 }
 0x463 PF: > { %v1677_v57 = vld [vmem:[%s2434_s2 + $0x18] sm:$0xff]  ;;  %v1676_v58 = vld [vmem:[%s2434_s2 + $0x10] sm:$0xff]  ;;  %v1675_v26 = vld [vmem:[%s2434_s2 + $0x8] sm:$0xff]  ;;  %vm1678_vm1 = vcmask 261120   ;;  %p1984_p0 = scmp.ne.s32.totalorder %s2235_s20, 1 }
 0x464   : > { %1703 = vmatpush.msra.mxu0 %v1677_v57  ;;  %v1747_v59 = vld [vmem:[%s2432_s14 + $0x78] sm:$0xff]  ;;  %v1746_v61 = vld [vmem:[%s2432_s14 + $0x70] sm:$0xff]  ;;  %v1674_v60 = vld [vmem:[%s2434_s2] sm:$0xff] }
 0x465   : > { %1748 = vmatpush.msra.mxu1 %v1747_v59  ;;  %v1745_v62 = vld [vmem:[%s2432_s14 + $0x68] sm:$0xff]  ;;  %1999 = vmatpush.msra.mxu2 %v1747_v59  ;;  %v1744_v63 = vld [vmem:[%s2432_s14 + $0x60] sm:$0xff]  ;;  %v1743_v0 = vld [vmem:[%s2432_s14 + $0x58] sm:$0xff] }
 0x466   : > { %1704 = vmatpush.msra.mxu0 %v1676_v58  ;;  %2000 = vmatpush.msra.mxu3 %v1747_v59  ;;  %v1670_v25 = vld [vmem:[#allocation12] sm:$0xff]  ;;  %v1742_v1 = vld [vmem:[%s2432_s14 + $0x50] sm:$0xff]  ;;  %v1740_v4 = vld [vmem:[%s2432_s14 + $0x40] sm:$0xff] }
 0x467   : > { %1749 = vmatpush.msra.mxu1 %v1746_v61  ;;  %2001 = vmatpush.msra.mxu2 %v1746_v61  ;;  %v1741_v2 = vld [vmem:[%s2432_s14 + $0x48] sm:$0xff]  ;;  %v1671_v3 = vld [vmem:[#allocation12 + $0x8] sm:$0xff]  ;;  %v1739_v5 = vld [vmem:[%s2432_s14 + $0x38] sm:$0xff] }
 0x468   : > { %1705 = vmatpush.msra.mxu0 %v1675_v26  ;;  %2002 = vmatpush.msra.mxu3 %v1746_v61  ;;  %v1738_v6 = vld [vmem:[%s2432_s14 + $0x30] sm:$0xff]  ;;  %v1737_v36 = vld [vmem:[%s2432_s14 + $0x28] sm:$0xff]  ;;  %v1672_v7 = vld [vmem:[#allocation12 + $0x10] sm:$0xff] }
 0x469   : > { %1750 = vmatpush.msra.mxu1 %v1745_v62  ;;  %2003 = vmatpush.msra.mxu2 %v1745_v62  ;;  %v1736_v8 = vld [vmem:[%s2432_s14 + $0x20] sm:$0xff]  ;;  %v1735_v9 = vld [vmem:[%s2432_s14 + $0x18] sm:$0xff]  ;;  %v1734_v11 = vld [vmem:[%s2432_s14 + $0x10] sm:$0xff] }
 0x46a   : > { %1706 = vmatpush.msra.mxu0 %v1674_v60  ;;  %2004 = vmatpush.msra.mxu3 %v1745_v62  ;;  %v1673_v10 = vld [vmem:[#allocation12 + $0x18] sm:$0xff]  ;;  %v1733_v12 = vld [vmem:[%s2432_s14 + $0x8] sm:$0xff]  ;;  %v1729_v28 = vld [vmem:[#allocation14 + $0x8] sm:$0xff] }
 0x46b   : > { %1980 = vmatmul.msk.f32.vlgmr.msra.gmra.mxu0 %vm1678_vm1, %v1670_v25  ;;  %1751 = vmatpush.msra.mxu1 %v1744_v63  ;;  %v1732_v13 = vld [vmem:[%s2432_s14] sm:$0xff]  ;;  %v1728_v30 = vld [vmem:[#allocation14] sm:$0xff]  ;;  %v1730_v37 = vld [vmem:[#allocation14 + $0x10] sm:$0xff] }
 0x46c   : > { %2005 = vmatpush.msra.mxu2 %v1744_v63  ;;  %2006 = vmatpush.msra.mxu3 %v1744_v63  ;;  %v1731_v39 = vld [vmem:[#allocation14 + $0x18] sm:$0xff] }
 0x46d   : > { %1752 = vmatpush.msra.mxu1 %v1743_v0 }
 0x46e   : > { %2007 = vmatpush.msra.mxu2 %v1743_v0  ;;  %2008 = vmatpush.msra.mxu3 %v1743_v0 }
 0x46f   : > { %1753 = vmatpush.msra.mxu1 %v1742_v1 }
 0x470   : > { %2009 = vmatpush.msra.mxu2 %v1742_v1  ;;  %2010 = vmatpush.msra.mxu3 %v1742_v1 }
 0x471   : > { %1754 = vmatpush.msra.mxu1 %v1741_v2 }
 0x472   : > { %2011 = vmatpush.msra.mxu2 %v1741_v2  ;;  %2012 = vmatpush.msra.mxu3 %v1741_v2 }
 0x473   : > { %1981 = vmatmul.msk.f32.gmra.mxu0 %vm1678_vm1, %v1671_v3  ;;  %1755 = vmatpush.msra.mxu1 %v1740_v4 }
 0x474   : > { %2013 = vmatpush.msra.mxu2 %v1740_v4  ;;  %2014 = vmatpush.msra.mxu3 %v1740_v4 }
 0x475   : > { %1756 = vmatpush.msra.mxu1 %v1739_v5 }
 0x476   : > { %2015 = vmatpush.msra.mxu2 %v1739_v5  ;;  %2016 = vmatpush.msra.mxu3 %v1739_v5 }
 0x477   : > { %1757 = vmatpush.msra.mxu1 %v1738_v6 }
 0x478   : > { %2017 = vmatpush.msra.mxu2 %v1738_v6  ;;  %2018 = vmatpush.msra.mxu3 %v1738_v6 }
 0x479   : > { %1758 = vmatpush.msra.mxu1 %v1737_v36 }
 0x47a   : > { %2019 = vmatpush.msra.mxu2 %v1737_v36  ;;  %2020 = vmatpush.msra.mxu3 %v1737_v36 }
 0x47b   : > { %1982 = vmatmul.msk.f32.gmra.mxu0 %vm1678_vm1, %v1672_v7  ;;  %1759 = vmatpush.msra.mxu1 %v1736_v8 }
 0x47c   : > { %2021 = vmatpush.msra.mxu2 %v1736_v8  ;;  %2022 = vmatpush.msra.mxu3 %v1736_v8 }
 0x47d   : > { %1760 = vmatpush.msra.mxu1 %v1735_v9 }
 0x47e   : > { %2023 = vmatpush.msra.mxu2 %v1735_v9  ;;  %2024 = vmatpush.msra.mxu3 %v1735_v9 }
 0x47f   : > { %1761 = vmatpush.msra.mxu1 %v1734_v11 }
 0x480   : > { %2025 = vmatpush.msra.mxu2 %v1734_v11  ;;  %2026 = vmatpush.msra.mxu3 %v1734_v11 }
 0x481   : > { %1762 = vmatpush.msra.mxu1 %v1733_v12 }
 0x482   : > { %2027 = vmatpush.msra.mxu2 %v1733_v12  ;;  %2028 = vmatpush.msra.mxu3 %v1733_v12 }
 0x483   : > { %1983 = vmatmul.msk.f32.gmra.mxu0 %vm1678_vm1, %v1673_v10  ;;  %1763 = vmatpush.msra.mxu1 %v1732_v13 }
 0x484   : > { %2029 = vmatpush.msra.mxu2 %v1732_v13  ;;  %2030 = vmatpush.msra.mxu3 %v1732_v13 }
 0x4e8   : > { %v1708_v14 = vpop.f32.mrf.mxu0 }
 0x4e9   : > { %v1720_v15 = vmax.f32 %v1708_v14, 0.0 }
 0x4eb   : > { %v1724_v16 = vmul.f32 %v1720_v15, %v1720_v15 }
 0x4ed   : > { %1764 = vmatmul.f32.vlgmr.msra.gmra.mxu1 %v1724_v16 }
 0x4f0   : > { %v1711_v18 = vpop.f32.mrf.mxu0 }
 0x4f1   : > { %v1721_v19 = vmax.f32 %v1711_v18, 0.0 }
 0x4f3   : > { %v1725_v20 = vmul.f32 %v1721_v19, %v1721_v19 }
 0x4f5   : > { %1767 = vmatmul.f32.vlgmr.msra.gmra.mxu2 %v1725_v20 }
 0x4f8   : > { %v1714_v21 = vpop.f32.mrf.mxu0 }
 0x4f9   : > { %v1722_v22 = vmax.f32 %v1714_v21, 0.0 }
 0x4fb   : > { %v1726_v23 = vmul.f32 %v1722_v22, %v1722_v22 }
 0x4fd   : > { %1770 = vmatmul.f32.vlgmr.msra.gmra.mxu3 %v1726_v23 }
 0x500   : > { %v1717_v24 = vpop.f32.mrf.mxu0 }
 0x501   : > { %v1723_v27 = vmax.f32 %v1717_v24, 0.0 }
 0x503   : > { %v1727_v29 = vmul.f32 %v1723_v27, %v1723_v27 }
 0x505   : > { %1773 = vmatmul.f32.gmra.mxu3 %v1727_v29 }
 0x56a   : > { %v1765_v31 = vpop.f32.mrf.mxu1 }
 0x56b   : > { %v1777_v32 = vadd.f32 %v1765_v31, %v1728_v30 }
 0x56d   : > { %1781 = vst.msk [vmem:[#allocation14] sm:$0xff] %vm1678_vm1, %v1777_v32 }
 0x578   : > { %v1768_v33 = vpop.f32.mrf.mxu2 }
 0x579   : > { %v1778_v34 = vadd.f32 %v1768_v33, %v1729_v28 }
 0x57b   : > { %1782 = vst.msk [vmem:[#allocation14 + $0x8] sm:$0xff] %vm1678_vm1, %v1778_v34 }
 0x580   : > { %v1771_v38 = vpop.f32.mrf.mxu3 }
 0x581   : > { %v1779_v17 = vadd.f32 %v1771_v38, %v1730_v37 }
 0x583   : > { %1783 = vst.msk [vmem:[#allocation14 + $0x10] sm:$0xff] %vm1678_vm1, %v1779_v17 }
 0x587   : > { %1788 = sbr.rel (%p1984_p0) target bundleno = 1432 (0x598), region = 146 }
 0x588   : > { %v1774_v41 = vpop.f32.mrf.mxu3 }
 0x589   : > { %v1780_v42 = vadd.f32 %v1774_v41, %v1731_v39 }
 0x58b   : > { %1784 = vst.msk [vmem:[#allocation14 + $0x18] sm:$0xff] %vm1678_vm1, %v1780_v42 }
 0x58c   : > { %v1789_v43 = vld [vmem:[#allocation11] sm:$0xff]  ;;  %v1790_v47 = vld [vmem:[#allocation11 + $0x8] sm:$0xff]  ;;  %v1791_v51 = vld [vmem:[#allocation11 + $0x10] sm:$0xff] }
 0x58d   : > { %v1793_v44 = vld [vmem:[#allocation13] sm:$0xff]  ;;  %v1794_v48 = vld [vmem:[#allocation13 + $0x8] sm:$0xff]  ;;  %v1795_v52 = vld [vmem:[#allocation13 + $0x10] sm:$0xff] }
 0x58e   : > { %v1797_v45 = vld [vmem:[#allocation14] sm:$0xff]  ;;  %v1798_v49 = vld [vmem:[#allocation14 + $0x8] sm:$0xff]  ;;  %v1799_v40 = vld [vmem:[#allocation14 + $0x10] sm:$0xff] }
 0x58f   : > { %v1801_v46 = vmul.f32 %v1797_v45, %v1793_v44  ;;  %v1802_v50 = vmul.f32 %v1798_v49, %v1794_v48  ;;  %v1803_v54 = vmul.f32 %v1799_v40, %v1795_v52  ;;  %v1792_v55 = vld [vmem:[#allocation11 + $0x18] sm:$0xff] }
 0x590   : > { %v1796_v35 = vld [vmem:[#allocation13 + $0x18] sm:$0xff] }
 0x591   : > { %v1805_v53 = vadd.f32 %v1801_v46, %v1789_v43  ;;  %v1806_v57 = vadd.f32 %v1802_v50, %v1790_v47  ;;  %v1807_v26 = vadd.f32 %v1803_v54, %v1791_v51 }
 0x592   : > { %v1800_v56 = vld [vmem:[#allocation14 + $0x18] sm:$0xff] }
 0x593   : > { %v1804_v58 = vmul.f32 %v1800_v56, %v1796_v35  ;;  %1809 = vst.msk [vmem:[%s2427_s1] sm:$0xff] %vm1678_vm1, %v1805_v53 }
 0x594   : > { %1810 = vst.msk [vmem:[%s2427_s1 + $0x8] sm:$0xff] %vm1678_vm1, %v1806_v57 }
 0x595   : > { %v1808_v59 = vadd.f32 %v1804_v58, %v1792_v55  ;;  %1811 = vst.msk [vmem:[%s2427_s1 + $0x10] sm:$0xff] %vm1678_vm1, %v1807_v26 }
 0x597   : > { %1812 = vst.msk [vmem:[%s2427_s1 + $0x18] sm:$0xff] %vm1678_vm1, %v1808_v59 }
 0x598 PF: > { %s2893_s20 = sld [smem:[#allocation19_spill]] }
 0x599   : > { %s2894_s0 = sld [smem:[#allocation16_spill]] }
 0x59a   : > { %s2895_s30 = sld [smem:[#allocation22_spill]] }
 0x59b   : > { %s2897_s21 = sld [smem:[#allocation18_spill]] }
 0x59c   : > { %s2898_s1 = sld [smem:[#allocation20_spill]] }
 0x59d   : > { %s2899_s22 = sld [smem:[#allocation21_spill]] }
 0x59e   : > { %s29_s2 = sadd.s32 1, %s2893_s20   ;;  %s2896_s20 = sld [smem:[#allocation17_spill]] }
 0x59f   : > { %p26_p1 = scmp.ge.s32.totalorder %s29_s2, 6  }
 0x5a1   :  { %28 = sbr.rel (!%p26_p1) target bundleno = 12 (0xc), region = 199 }

</bundles_post_ra>
